<compile_context>
chip_gen: v7x
topology: tpu7x:2x2x1
jax: 0.10.0
libtpu: 0.0.40
codegen_flags: <defaults>
</compile_context>

<pallas_src>
import functools

import jax
import jax.numpy as jnp
from jax.experimental import pallas as pl
from jax.experimental.pallas import tpu as pltpu


def _round_up(x, m):
    return ((x + m - 1) // m) * m


_HAS_BUFFERED = hasattr(pl, "Buffered")


def _spec(shape, index_map, buffers=None):
    """BlockSpec with an optional explicit buffer depth (graceful fallback)."""
    if buffers is None or not _HAS_BUFFERED:
        return pl.BlockSpec(shape, index_map)
    try:
        return pl.BlockSpec(shape, index_map, pipeline_mode=pl.Buffered(buffers))
    except TypeError:
        return pl.BlockSpec(shape, index_map)


def _vmem_budget_bytes():
    """Generation-aware VMEM budget: headroom below physical capacity.

    ~100 MiB on 128-MiB parts (v5e/v6e), ~56 MiB on 64-MiB parts (v7x).
    """
    cap = 128 << 20
    try:
        cap = int(pltpu.get_tpu_info().vmem_capacity_bytes)
    except Exception:
        pass
    return int(min(cap - (8 << 20), 100 << 20))


def _select_tiles(M, H, V, budget, tm_req=None, tn_req=None):
    """Pick (row tile tm, fc2 output panel tn) that fit the VMEM budget."""
    # fc2 output-column panel: largest 128-multiple divisor of V (lane-dense).
    if tn_req is not None:
        tn_cands = [tn_req]
    elif V % 128 == 0:
        tn_cands = [t for t in range(min(V, 1024), 0, -128) if V % t == 0] or [V]
    else:
        tn_cands = [V]

    # Bigger tm => higher arithmetic intensity for the fc2 streaming phase.
    # 64-MiB parts (v7x) only need ~512 (roofline crossover ~320 rows);
    # 128-MiB parts (v5e/v6e) go up to 1024 (v6e crossover ~650 rows).
    tm_cap = 512 if budget <= (60 << 20) else 1024
    if tm_req is not None:
        tm_cands = [tm_req]
    else:
        tm_cands = [t for t in (1024, 768, 512, 384, 256, 128) if t <= tm_cap]

    # Grid-invariant, single-buffered weights (LM head + concatenated fc1).
    const_bytes = H * V * 2 + V * 4 + 2 * V * V * 2 + 2 * V * 4
    slack = 2 << 20
    for tm in tm_cands:
        for tn in tn_cands:
            need = (const_bytes
                    + 2 * tm * H * 2                     # hidden row tile (2 bufs)
                    + 3 * 2 * (V * tn * 2 + tn * 4)      # fc2 W/b panels (3 bufs)
                    + 2 * 2 * tm * tn * 4                # two f32 output tiles (2 bufs)
                    + 2 * tm * V * 2                     # hcs scratch
                    + slack)
            if need <= budget:
                return tm, tn
    return tm_cands[-1], tn_cands[-1]   # small problems always fit in practice


def _tispell_head_kernel(h_ref, wlm_ref, blm_ref, w1_ref, b1_ref,
                         wc2_ref, bc2_ref, ws2_ref, bs2_ref,
                         logit_ref, logit_c_ref, hcs_ref, *, v):
    """LM head -> fused (char|syll) fc1 + ReLU -> fc2 column panels -> sum.

    Grid = (row_tiles, fc2_output_panels).  The LM head and the wide fc1 run
    once per row tile (j == 0); the bf16 ReLU activations live in the 3-D
    scratch hcs_ref[(2, tm, V)] and are reused for every fc2 output panel j.
    """
    j = pl.program_id(1)

    @pl.when(j == 0)
    def _():
        # Synthetic "roberta" LM head: hidden -> vocab logits (f32 accumulate).
        logits = jnp.dot(h_ref[...], wlm_ref[...],
                         preferred_element_type=jnp.float32) + blm_ref[...]
        # Both DownStreamer fc1 layers fused into one wide [V, 2V] dot.
        pre = jnp.dot(logits.astype(jnp.bfloat16), w1_ref[...],
                      preferred_element_type=jnp.float32) + b1_ref[...]
        act = jnp.maximum(pre, 0.0).astype(jnp.bfloat16)          # ReLU, [tm, 2V]
        hcs_ref[0] = act[:, :v]      # character-branch activations [tm, V]
        hcs_ref[1] = act[:, v:]      # syllable-branch  activations [tm, V]

    # DownStreamer fc2 (output-column panel j of the vocabulary).
    logit_c = jnp.dot(hcs_ref[0], wc2_ref[...],
                      preferred_element_type=jnp.float32) + bc2_ref[...]
    logit_s = jnp.dot(hcs_ref[1], ws2_ref[...],
                      preferred_element_type=jnp.float32) + bs2_ref[...]

    logit_c_ref[...] = logit_c
    logit_ref[...] = logit_c + logit_s


def prepare_params(params):
    """One-time weight preparation (bf16 casts + fc1 concat).

    Cache the result across forward calls -- doing this per call re-streams
    every weight matrix through HBM before the kernel even starts.
    """
    bf16, f32 = jnp.bfloat16, jnp.float32
    return {
        "embedding": params["embedding"],
        "w_lm": params["w_lm"].astype(bf16),                          # [H, V]
        "b_lm": params["b_lm"].astype(f32),                           # [1, V]
        "w1": jnp.concatenate([params["w_c1"], params["w_s1"]],
                              axis=1).astype(bf16),                   # [V, 2V]
        "b1": jnp.concatenate([params["b_c1"], params["b_s1"]],
                              axis=1).astype(f32),                    # [1, 2V]
        "w_c2": params["w_c2"].astype(bf16), "b_c2": params["b_c2"].astype(f32),
        "w_s2": params["w_s2"].astype(bf16), "b_s2": params["b_s2"].astype(f32),
    }


def tispell_forward(input_ids, prep, *, tm=None, tn=None):
    """Forward pass.  input_ids: [B, S] int32; prep from prepare_params().

    Returns (logit, logit_c), each [B, S, V] float32.
    """
    emb = prep["embedding"]
    wlm, blm = prep["w_lm"], prep["b_lm"]
    w1, b1 = prep["w1"], prep["b1"]
    wc2, bc2 = prep["w_c2"], prep["b_c2"]
    ws2, bs2 = prep["w_s2"], prep["b_s2"]

    B, S = input_ids.shape
    H, V = wlm.shape
    M = B * S

    budget = _vmem_budget_bytes()
    tm_t, tn_eff = _select_tiles(M, H, V, budget, tm, tn)
    if M <= tm_t:
        tm_eff = max(16, _round_up(M, 16))   # 16-row floor: full bf16 sublane packing
        M_pad = tm_eff
    else:
        tm_eff = tm_t
        M_pad = _round_up(M, tm_eff)

    # Glue: embedding lookup + LM-head stand-in for the HF RoBERTa backbone.
    # TODO(synk): the pretrained transformer encoder is not reproduced here;
    # the corrector heads downstream of hidden_states are exact.
    hidden = emb[input_ids.reshape(-1)].astype(jnp.bfloat16)          # [M, H]
    if M_pad != M:
        hidden = jnp.pad(hidden, ((0, M_pad - M), (0, 0)))

    grid = (M_pad // tm_eff, V // tn_eff)
    row_tiles, col_tiles = grid
    panel_buf = 1 if col_tiles == 1 else (2 if col_tiles == 2 else 3)

    # Cost estimate: LM head + wide fc1 + 2x fc2; fc2 weight panels are
    # re-fetched once per row tile.
    flops = int(2 * M_pad * V * (H + 4 * V))
    bytes_accessed = int(
        M_pad * H * 2                                     # bf16 hidden
        + (H * V + 2 * V * V) * 2 + 3 * V * 4             # LM head + fc1 (fetched once)
        + row_tiles * (2 * V * V * 2 + 2 * V * 4)         # fc2 panels per row tile
        + 2 * M_pad * V * 4)                              # two f32 outputs
    cost = pl.CostEstimate(flops=flops, transcendentals=0,
                           bytes_accessed=bytes_accessed)

    kernel = functools.partial(_tispell_head_kernel, v=V)
    out_shape = (jax.ShapeDtypeStruct((M_pad, V), jnp.float32),
                 jax.ShapeDtypeStruct((M_pad, V), jnp.float32))

    def build(use_explicit_buffering):
        cbuf = 1 if use_explicit_buffering else None      # grid-invariant weights
        pbuf = panel_buf if use_explicit_buffering else None
        in_specs = [
            pl.BlockSpec((tm_eff, H), lambda i, j: (i, 0)),           # hidden rows
            _spec((H, V), lambda i, j: (0, 0), cbuf),                 # LM head W
            _spec((1, V), lambda i, j: (0, 0), cbuf),                 # LM head b
            _spec((V, 2 * V), lambda i, j: (0, 0), cbuf),             # fc1 W (char|syll)
            _spec((1, 2 * V), lambda i, j: (0, 0), cbuf),             # fc1 b (char|syll)
            _spec((V, tn_eff), lambda i, j: (0, j), pbuf),            # char fc2 W panel
            _spec((1, tn_eff), lambda i, j: (0, j), pbuf),            # char fc2 b panel
            _spec((V, tn_eff), lambda i, j: (0, j), pbuf),            # syll fc2 W panel
            _spec((1, tn_eff), lambda i, j: (0, j), pbuf),            # syll fc2 b panel
        ]
        return pl.pallas_call(
            kernel,
            out_shape=out_shape,
            grid_spec=pltpu.PrefetchScalarGridSpec(
                num_scalar_prefetch=0,
                grid=grid,
                in_specs=in_specs,
                out_specs=[
                    pl.BlockSpec((tm_eff, tn_eff), lambda i, j: (i, j)),  # logit
                    pl.BlockSpec((tm_eff, tn_eff), lambda i, j: (i, j)),  # logit_c
                ],
                scratch_shapes=[pltpu.VMEM((2, tm_eff, V), jnp.bfloat16)]),
            compiler_params=pltpu.CompilerParams(
                dimension_semantics=("parallel", "arbitrary"),
                vmem_limit_bytes=budget),
            cost_estimate=cost,
        )

    args = (hidden, wlm, blm, w1, b1, wc2, bc2, ws2, bs2)
    try:
        logit_flat, logit_c_flat = build(True)(*args)
    except Exception:
        # Fallback if explicit pipeline_mode is unsupported by the running JAX.
        logit_flat, logit_c_flat = build(False)(*args)

    logit = logit_flat[:M].reshape(B, S, V)
    logit_c = logit_c_flat[:M].reshape(B, S, V)
    return logit, logit_c


def make_params(key, *, vocab_in, hidden, vocab_out):
    """Deterministic synthetic parameters (no checkpoint load)."""
    ks = jax.random.split(key, 11)
    s = 0.02
    n = lambda k, shape: s * jax.random.normal(k, shape, jnp.float32)
    return {
        "embedding": n(ks[0], (vocab_in, hidden)),
        "w_lm": n(ks[1], (hidden, vocab_out)), "b_lm": n(ks[2], (1, vocab_out)),
        # character_corrector: Linear(V,V) -> ReLU -> Linear(V,V)
        "w_c1": n(ks[3], (vocab_out, vocab_out)), "b_c1": n(ks[4], (1, vocab_out)),
        "w_c2": n(ks[5], (vocab_out, vocab_out)), "b_c2": n(ks[6], (1, vocab_out)),
        # syllable_corrector: Linear(V,V) -> ReLU -> Linear(V,V)
        "w_s1": n(ks[7], (vocab_out, vocab_out)), "b_s1": n(ks[8], (1, vocab_out)),
        "w_s2": n(ks[9], (vocab_out, vocab_out)), "b_s2": n(ks[10], (1, vocab_out)),
    }


def _reference(input_ids, params):
    """Pure-JAX reference mirroring the kernel's dtype policy (bf16 operands,
    f32 accumulation) so the comparison is tight."""
    bf16, f32 = jnp.bfloat16, jnp.float32
    hidden = params["embedding"][input_ids].astype(bf16)                  # [B,S,H]
    logits = jnp.dot(hidden, params["w_lm"].astype(bf16),
                     preferred_element_type=f32) + params["b_lm"][0]
    l16 = logits.astype(bf16)
    h_c = jnp.maximum(jnp.dot(l16, params["w_c1"].astype(bf16),
                              preferred_element_type=f32) + params["b_c1"][0], 0.0).astype(bf16)
    h_s = jnp.maximum(jnp.dot(l16, params["w_s1"].astype(bf16),
                              preferred_element_type=f32) + params["b_s1"][0], 0.0).astype(bf16)
    logit_c = jnp.dot(h_c, params["w_c2"].astype(bf16),
                      preferred_element_type=f32) + params["b_c2"][0]
    logit_s = jnp.dot(h_s, params["w_s2"].astype(bf16),
                      preferred_element_type=f32) + params["b_s2"][0]
    return logit_c + logit_s, logit_c


if __name__ == "__main__":
    # Small shapes: batch=2, seq=8, hidden=32, vocab=128.
    B, S, H, V = 2, 8, 32, 128
    VOCAB_IN = 64   # input-id vocabulary for the synthetic embedding table

    key = jax.random.PRNGKey(0)
    k_ids, k_params = jax.random.split(key)

    input_ids = jax.random.randint(k_ids, (B, S), 0, VOCAB_IN, dtype=jnp.int32)
    params = make_params(k_params, vocab_in=VOCAB_IN, hidden=H, vocab_out=V)
    prep = prepare_params(params)   # hoisted, cacheable weight preparation

    logit, logit_c = tispell_forward(input_ids, prep)
    jax.block_until_ready((logit, logit_c))

    ref_logit, ref_logit_c = _reference(input_ids, params)
    assert logit.shape == (B, S, V) and logit_c.shape == (B, S, V)
    assert jnp.allclose(logit, ref_logit, atol=1e-3, rtol=1e-2)
    assert jnp.allclose(logit_c, ref_logit_c, atol=1e-3, rtol=1e-2)

    print("KERNEL_OK")
</pallas_src>

<mosaic_0001>
module attributes {stable_mosaic.version = 11 : i64} {
  func.func @_tispell_head_kernel(%arg0: i32, %arg1: i32, %arg2: memref<16x32xbf16, #tpu.memory_space<vmem>>, %arg3: memref<32x128xbf16, #tpu.memory_space<vmem>>, %arg4: memref<1x128xf32, #tpu.memory_space<vmem>>, %arg5: memref<128x256xbf16, #tpu.memory_space<vmem>>, %arg6: memref<1x256xf32, #tpu.memory_space<vmem>>, %arg7: memref<128x128xbf16, #tpu.memory_space<vmem>>, %arg8: memref<1x128xf32, #tpu.memory_space<vmem>>, %arg9: memref<128x128xbf16, #tpu.memory_space<vmem>>, %arg10: memref<1x128xf32, #tpu.memory_space<vmem>>, %arg11: memref<16x128xf32, #tpu.memory_space<vmem>>, %arg12: memref<16x128xf32, #tpu.memory_space<vmem>>, %arg13: memref<2x16x128xbf16, #tpu.memory_space<vmem>>) attributes {dimension_semantics = [#tpu.dimension_semantics<parallel>, #tpu.dimension_semantics<arbitrary>], iteration_bounds = array<i64: 1, 1>, scalar_prefetch = 0 : i64, scratch_operands = 1 : i64, tpu.core_type = #tpu.core_type<tc>, window_params = [{transform_indices = @transform_0, window_bounds = array<i64: 16, 32>}, {pipeline_mode = #tpu.pipeline_mode<synchronous>, transform_indices = @transform_1, window_bounds = array<i64: 32, 128>}, {pipeline_mode = #tpu.pipeline_mode<synchronous>, transform_indices = @transform_2, window_bounds = array<i64: 1, 128>}, {pipeline_mode = #tpu.pipeline_mode<synchronous>, transform_indices = @transform_3, window_bounds = array<i64: 128, 256>}, {pipeline_mode = #tpu.pipeline_mode<synchronous>, transform_indices = @transform_4, window_bounds = array<i64: 1, 256>}, {pipeline_mode = #tpu.pipeline_mode<synchronous>, transform_indices = @transform_5, window_bounds = array<i64: 128, 128>}, {pipeline_mode = #tpu.pipeline_mode<synchronous>, transform_indices = @transform_6, window_bounds = array<i64: 1, 128>}, {pipeline_mode = #tpu.pipeline_mode<synchronous>, transform_indices = @transform_7, window_bounds = array<i64: 128, 128>}, {pipeline_mode = #tpu.pipeline_mode<synchronous>, transform_indices = @transform_8, window_bounds = array<i64: 1, 128>}, {transform_indices = @transform_9, window_bounds = array<i64: 16, 128>}, {transform_indices = @transform_10, window_bounds = array<i64: 16, 128>}]} {
    %c0_i32 = arith.constant 0 : i32
    %0 = arith.cmpi eq, %arg1, %c0_i32 : i32
    %1 = arith.extui %0 : i1 to i32
    %c0_i32_0 = arith.constant 0 : i32
    %2 = arith.cmpi ne, %1, %c0_i32_0 : i32
    scf.if %2 {
      %c0_18 = arith.constant 0 : index
      %c0_19 = arith.constant 0 : index
      %20 = vector.load %arg2[%c0_18, %c0_19] : memref<16x32xbf16, #tpu.memory_space<vmem>>, vector<16x32xbf16>
      %c0_20 = arith.constant 0 : index
      %c0_21 = arith.constant 0 : index
      %21 = vector.load %arg3[%c0_20, %c0_21] : memref<32x128xbf16, #tpu.memory_space<vmem>>, vector<32x128xbf16>
      %cst_22 = arith.constant dense<0.000000e+00> : vector<16x128xf32>
      %22 = tpu.matmul %20, %21, %cst_22 {dimension_numbers = #tpu.dot_dimension_numbers<[1], [0], [0], [1], [0, 0, 1, 1], [], []>} : vector<16x32xbf16>, vector<32x128xbf16>, vector<16x128xf32> -> vector<16x128xf32>
      %c0_23 = arith.constant 0 : index
      %c0_24 = arith.constant 0 : index
      %23 = vector.load %arg4[%c0_23, %c0_24] : memref<1x128xf32, #tpu.memory_space<vmem>>, vector<1x128xf32>
      %24 = vector.broadcast %23 : vector<1x128xf32> to vector<16x128xf32>
      %25 = arith.addf %22, %24 : vector<16x128xf32>
      %26 = arith.truncf %25 : vector<16x128xf32> to vector<16x128xbf16>
      %c0_25 = arith.constant 0 : index
      %c0_26 = arith.constant 0 : index
      %27 = vector.load %arg5[%c0_25, %c0_26] : memref<128x256xbf16, #tpu.memory_space<vmem>>, vector<128x256xbf16>
      %cst_27 = arith.constant dense<0.000000e+00> : vector<16x256xf32>
      %28 = tpu.matmul %26, %27, %cst_27 {dimension_numbers = #tpu.dot_dimension_numbers<[1], [0], [0], [1], [0, 0, 1, 1], [], []>} : vector<16x128xbf16>, vector<128x256xbf16>, vector<16x256xf32> -> vector<16x256xf32>
      %c0_28 = arith.constant 0 : index
      %c0_29 = arith.constant 0 : index
      %29 = vector.load %arg6[%c0_28, %c0_29] : memref<1x256xf32, #tpu.memory_space<vmem>>, vector<1x256xf32>
      %30 = vector.broadcast %29 : vector<1x256xf32> to vector<16x256xf32>
      %31 = arith.addf %28, %30 : vector<16x256xf32>
      %cst_30 = arith.constant 0.000000e+00 : f32
      %32 = vector.broadcast %cst_30 : f32 to vector<16x256xf32>
      %33 = arith.maximumf %31, %32 : vector<16x256xf32>
      %34 = arith.truncf %33 : vector<16x256xf32> to vector<16x256xbf16>
      %35 = vector.extract_strided_slice %34 {offsets = [0, 0], sizes = [16, 128], strides = [1, 1]} : vector<16x256xbf16> to vector<16x128xbf16>
      %c0_31 = arith.constant 0 : index
      %c0_32 = arith.constant 0 : index
      %c0_33 = arith.constant 0 : index
      %36 = vector.load %arg13[%c0_31, %c0_32, %c0_33] : memref<2x16x128xbf16, #tpu.memory_space<vmem>>, vector<1x16x128xbf16>
      %37 = vector.shape_cast %36 : vector<1x16x128xbf16> to vector<16x128xbf16>
      %38 = vector.shape_cast %35 : vector<16x128xbf16> to vector<1x16x128xbf16>
      tpu.vector_store %arg13[%c0_31, %c0_32, %c0_33], %38 {strides = array<i32>} : memref<2x16x128xbf16, #tpu.memory_space<vmem>>, vector<1x16x128xbf16>,
      %39 = vector.extract_strided_slice %34 {offsets = [0, 128], sizes = [16, 128], strides = [1, 1]} : vector<16x256xbf16> to vector<16x128xbf16>
      %c1_34 = arith.constant 1 : index
      %c0_35 = arith.constant 0 : index
      %c0_36 = arith.constant 0 : index
      %40 = vector.load %arg13[%c1_34, %c0_35, %c0_36] : memref<2x16x128xbf16, #tpu.memory_space<vmem>>, vector<1x16x128xbf16>
      %41 = vector.shape_cast %40 : vector<1x16x128xbf16> to vector<16x128xbf16>
      %42 = vector.shape_cast %39 : vector<16x128xbf16> to vector<1x16x128xbf16>
      tpu.vector_store %arg13[%c1_34, %c0_35, %c0_36], %42 {strides = array<i32>} : memref<2x16x128xbf16, #tpu.memory_space<vmem>>, vector<1x16x128xbf16>,
    } else {
    }
    %c0 = arith.constant 0 : index
    %c0_1 = arith.constant 0 : index
    %c0_2 = arith.constant 0 : index
    %3 = vector.load %arg13[%c0, %c0_1, %c0_2] : memref<2x16x128xbf16, #tpu.memory_space<vmem>>, vector<1x16x128xbf16>
    %4 = vector.shape_cast %3 : vector<1x16x128xbf16> to vector<16x128xbf16>
    %c0_3 = arith.constant 0 : index
    %c0_4 = arith.constant 0 : index
    %5 = vector.load %arg7[%c0_3, %c0_4] : memref<128x128xbf16, #tpu.memory_space<vmem>>, vector<128x128xbf16>
    %cst = arith.constant dense<0.000000e+00> : vector<16x128xf32>
    %6 = tpu.matmul %4, %5, %cst {dimension_numbers = #tpu.dot_dimension_numbers<[1], [0], [0], [1], [0, 0, 1, 1], [], []>} : vector<16x128xbf16>, vector<128x128xbf16>, vector<16x128xf32> -> vector<16x128xf32>
    %c0_5 = arith.constant 0 : index
    %c0_6 = arith.constant 0 : index
    %7 = vector.load %arg8[%c0_5, %c0_6] : memref<1x128xf32, #tpu.memory_space<vmem>>, vector<1x128xf32>
    %8 = vector.broadcast %7 : vector<1x128xf32> to vector<16x128xf32>
    %9 = arith.addf %6, %8 : vector<16x128xf32>
    %c1 = arith.constant 1 : index
    %c0_7 = arith.constant 0 : index
    %c0_8 = arith.constant 0 : index
    %10 = vector.load %arg13[%c1, %c0_7, %c0_8] : memref<2x16x128xbf16, #tpu.memory_space<vmem>>, vector<1x16x128xbf16>
    %11 = vector.shape_cast %10 : vector<1x16x128xbf16> to vector<16x128xbf16>
    %c0_9 = arith.constant 0 : index
    %c0_10 = arith.constant 0 : index
    %12 = vector.load %arg9[%c0_9, %c0_10] : memref<128x128xbf16, #tpu.memory_space<vmem>>, vector<128x128xbf16>
    %cst_11 = arith.constant dense<0.000000e+00> : vector<16x128xf32>
    %13 = tpu.matmul %11, %12, %cst_11 {dimension_numbers = #tpu.dot_dimension_numbers<[1], [0], [0], [1], [0, 0, 1, 1], [], []>} : vector<16x128xbf16>, vector<128x128xbf16>, vector<16x128xf32> -> vector<16x128xf32>
    %c0_12 = arith.constant 0 : index
    %c0_13 = arith.constant 0 : index
    %14 = vector.load %arg10[%c0_12, %c0_13] : memref<1x128xf32, #tpu.memory_space<vmem>>, vector<1x128xf32>
    %15 = vector.broadcast %14 : vector<1x128xf32> to vector<16x128xf32>
    %16 = arith.addf %13, %15 : vector<16x128xf32>
    %c0_14 = arith.constant 0 : index
    %c0_15 = arith.constant 0 : index
    %17 = vector.load %arg12[%c0_14, %c0_15] : memref<16x128xf32, #tpu.memory_space<vmem>>, vector<16x128xf32>
    tpu.vector_store %arg12[%c0_14, %c0_15], %9 {strides = array<i32>} : memref<16x128xf32, #tpu.memory_space<vmem>>, vector<16x128xf32>,
    %18 = arith.addf %9, %16 : vector<16x128xf32>
    %c0_16 = arith.constant 0 : index
    %c0_17 = arith.constant 0 : index
    %19 = vector.load %arg11[%c0_16, %c0_17] : memref<16x128xf32, #tpu.memory_space<vmem>>, vector<16x128xf32>
    tpu.vector_store %arg11[%c0_16, %c0_17], %18 {strides = array<i32>} : memref<16x128xf32, #tpu.memory_space<vmem>>, vector<16x128xf32>,
    return
  }
  func.func @transform_0(%arg0: i32, %arg1: i32) -> (i32, i32) {
    %c0_i32 = arith.constant 0 : i32
    %c0_i32_0 = arith.constant 0 : i32
    return %arg0, %c0_i32 : i32, i32
  }
  func.func @transform_1(%arg0: i32, %arg1: i32) -> (i32, i32) {
    %c0_i32 = arith.constant 0 : i32
    %c0_i32_0 = arith.constant 0 : i32
    %c0_i32_1 = arith.constant 0 : i32
    return %c0_i32, %c0_i32_0 : i32, i32
  }
  func.func @transform_2(%arg0: i32, %arg1: i32) -> (i32, i32) {
    %c0_i32 = arith.constant 0 : i32
    %c0_i32_0 = arith.constant 0 : i32
    %c0_i32_1 = arith.constant 0 : i32
    return %c0_i32, %c0_i32_0 : i32, i32
  }
  func.func @transform_3(%arg0: i32, %arg1: i32) -> (i32, i32) {
    %c0_i32 = arith.constant 0 : i32
    %c0_i32_0 = arith.constant 0 : i32
    %c0_i32_1 = arith.constant 0 : i32
    return %c0_i32, %c0_i32_0 : i32, i32
  }
  func.func @transform_4(%arg0: i32, %arg1: i32) -> (i32, i32) {
    %c0_i32 = arith.constant 0 : i32
    %c0_i32_0 = arith.constant 0 : i32
    %c0_i32_1 = arith.constant 0 : i32
    return %c0_i32, %c0_i32_0 : i32, i32
  }
  func.func @transform_5(%arg0: i32, %arg1: i32) -> (i32, i32) {
    %c0_i32 = arith.constant 0 : i32
    %c0_i32_0 = arith.constant 0 : i32
    return %c0_i32, %arg1 : i32, i32
  }
  func.func @transform_6(%arg0: i32, %arg1: i32) -> (i32, i32) {
    %c0_i32 = arith.constant 0 : i32
    %c0_i32_0 = arith.constant 0 : i32
    return %c0_i32, %arg1 : i32, i32
  }
  func.func @transform_7(%arg0: i32, %arg1: i32) -> (i32, i32) {
    %c0_i32 = arith.constant 0 : i32
    %c0_i32_0 = arith.constant 0 : i32
    return %c0_i32, %arg1 : i32, i32
  }
  func.func @transform_8(%arg0: i32, %arg1: i32) -> (i32, i32) {
    %c0_i32 = arith.constant 0 : i32
    %c0_i32_0 = arith.constant 0 : i32
    return %c0_i32, %arg1 : i32, i32
  }
  func.func @transform_9(%arg0: i32, %arg1: i32) -> (i32, i32) {
    %c0_i32 = arith.constant 0 : i32
    return %arg0, %arg1 : i32, i32
  }
  func.func @transform_10(%arg0: i32, %arg1: i32) -> (i32, i32) {
    %c0_i32 = arith.constant 0 : i32
    return %arg0, %arg1 : i32, i32
  }
}

module attributes {stable_mosaic.version = 11 : i64} {
  func.func @_tispell_head_kernel(%arg0: i32, %arg1: i32, %arg2: memref<16x32xbf16, #tpu.memory_space<vmem>>, %arg3: memref<32x128xbf16, #tpu.memory_space<vmem>>, %arg4: memref<1x128xf32, #tpu.memory_space<vmem>>, %arg5: memref<128x256xbf16, #tpu.memory_space<vmem>>, %arg6: memref<1x256xf32, #tpu.memory_space<vmem>>, %arg7: memref<128x128xbf16, #tpu.memory_space<vmem>>, %arg8: memref<1x128xf32, #tpu.memory_space<vmem>>, %arg9: memref<128x128xbf16, #tpu.memory_space<vmem>>, %arg10: memref<1x128xf32, #tpu.memory_space<vmem>>, %arg11: memref<16x128xf32, #tpu.memory_space<vmem>>, %arg12: memref<16x128xf32, #tpu.memory_space<vmem>>, %arg13: memref<2x16x128xbf16, #tpu.memory_space<vmem>>) attributes {dimension_semantics = [#tpu.dimension_semantics<parallel>, #tpu.dimension_semantics<arbitrary>], iteration_bounds = array<i64: 1, 1>, scalar_prefetch = 0 : i64, scratch_operands = 1 : i64, tpu.core_type = #tpu.core_type<tc>, window_params = [{transform_indices = @transform_0, window_bounds = array<i64: 16, 32>}, {pipeline_mode = #tpu.pipeline_mode<synchronous>, transform_indices = @transform_1, window_bounds = array<i64: 32, 128>}, {pipeline_mode = #tpu.pipeline_mode<synchronous>, transform_indices = @transform_2, window_bounds = array<i64: 1, 128>}, {pipeline_mode = #tpu.pipeline_mode<synchronous>, transform_indices = @transform_3, window_bounds = array<i64: 128, 256>}, {pipeline_mode = #tpu.pipeline_mode<synchronous>, transform_indices = @transform_4, window_bounds = array<i64: 1, 256>}, {transform_indices = @transform_5, window_bounds = array<i64: 128, 128>}, {transform_indices = @transform_6, window_bounds = array<i64: 1, 128>}, {transform_indices = @transform_7, window_bounds = array<i64: 128, 128>}, {transform_indices = @transform_8, window_bounds = array<i64: 1, 128>}, {transform_indices = @transform_9, window_bounds = array<i64: 16, 128>}, {transform_indices = @transform_10, window_bounds = array<i64: 16, 128>}]} {
    %c0_i32 = arith.constant 0 : i32
    %0 = arith.cmpi eq, %arg1, %c0_i32 : i32
    %1 = arith.extui %0 : i1 to i32
    %c0_i32_0 = arith.constant 0 : i32
    %2 = arith.cmpi ne, %1, %c0_i32_0 : i32
    scf.if %2 {
      %c0_18 = arith.constant 0 : index
      %c0_19 = arith.constant 0 : index
      %20 = vector.load %arg2[%c0_18, %c0_19] : memref<16x32xbf16, #tpu.memory_space<vmem>>, vector<16x32xbf16>
      %c0_20 = arith.constant 0 : index
      %c0_21 = arith.constant 0 : index
      %21 = vector.load %arg3[%c0_20, %c0_21] : memref<32x128xbf16, #tpu.memory_space<vmem>>, vector<32x128xbf16>
      %cst_22 = arith.constant dense<0.000000e+00> : vector<16x128xf32>
      %22 = tpu.matmul %20, %21, %cst_22 {dimension_numbers = #tpu.dot_dimension_numbers<[1], [0], [0], [1], [0, 0, 1, 1], [], []>} : vector<16x32xbf16>, vector<32x128xbf16>, vector<16x128xf32> -> vector<16x128xf32>
      %c0_23 = arith.constant 0 : index
      %c0_24 = arith.constant 0 : index
      %23 = vector.load %arg4[%c0_23, %c0_24] : memref<1x128xf32, #tpu.memory_space<vmem>>, vector<1x128xf32>
      %24 = vector.broadcast %23 : vector<1x128xf32> to vector<16x128xf32>
      %25 = arith.addf %22, %24 : vector<16x128xf32>
      %26 = arith.truncf %25 : vector<16x128xf32> to vector<16x128xbf16>
      %c0_25 = arith.constant 0 : index
      %c0_26 = arith.constant 0 : index
      %27 = vector.load %arg5[%c0_25, %c0_26] : memref<128x256xbf16, #tpu.memory_space<vmem>>, vector<128x256xbf16>
      %cst_27 = arith.constant dense<0.000000e+00> : vector<16x256xf32>
      %28 = tpu.matmul %26, %27, %cst_27 {dimension_numbers = #tpu.dot_dimension_numbers<[1], [0], [0], [1], [0, 0, 1, 1], [], []>} : vector<16x128xbf16>, vector<128x256xbf16>, vector<16x256xf32> -> vector<16x256xf32>
      %c0_28 = arith.constant 0 : index
      %c0_29 = arith.constant 0 : index
      %29 = vector.load %arg6[%c0_28, %c0_29] : memref<1x256xf32, #tpu.memory_space<vmem>>, vector<1x256xf32>
      %30 = vector.broadcast %29 : vector<1x256xf32> to vector<16x256xf32>
      %31 = arith.addf %28, %30 : vector<16x256xf32>
      %cst_30 = arith.constant 0.000000e+00 : f32
      %32 = vector.broadcast %cst_30 : f32 to vector<16x256xf32>
      %33 = arith.maximumf %31, %32 : vector<16x256xf32>
      %34 = arith.truncf %33 : vector<16x256xf32> to vector<16x256xbf16>
      %35 = vector.extract_strided_slice %34 {offsets = [0, 0], sizes = [16, 128], strides = [1, 1]} : vector<16x256xbf16> to vector<16x128xbf16>
      %c0_31 = arith.constant 0 : index
      %c0_32 = arith.constant 0 : index
      %c0_33 = arith.constant 0 : index
      %36 = vector.load %arg13[%c0_31, %c0_32, %c0_33] : memref<2x16x128xbf16, #tpu.memory_space<vmem>>, vector<1x16x128xbf16>
      %37 = vector.shape_cast %36 : vector<1x16x128xbf16> to vector<16x128xbf16>
      %38 = vector.shape_cast %35 : vector<16x128xbf16> to vector<1x16x128xbf16>
      tpu.vector_store %arg13[%c0_31, %c0_32, %c0_33], %38 {strides = array<i32>} : memref<2x16x128xbf16, #tpu.memory_space<vmem>>, vector<1x16x128xbf16>,
      %39 = vector.extract_strided_slice %34 {offsets = [0, 128], sizes = [16, 128], strides = [1, 1]} : vector<16x256xbf16> to vector<16x128xbf16>
      %c1_34 = arith.constant 1 : index
      %c0_35 = arith.constant 0 : index
      %c0_36 = arith.constant 0 : index
      %40 = vector.load %arg13[%c1_34, %c0_35, %c0_36] : memref<2x16x128xbf16, #tpu.memory_space<vmem>>, vector<1x16x128xbf16>
      %41 = vector.shape_cast %40 : vector<1x16x128xbf16> to vector<16x128xbf16>
      %42 = vector.shape_cast %39 : vector<16x128xbf16> to vector<1x16x128xbf16>
      tpu.vector_store %arg13[%c1_34, %c0_35, %c0_36], %42 {strides = array<i32>} : memref<2x16x128xbf16, #tpu.memory_space<vmem>>, vector<1x16x128xbf16>,
    } else {
    }
    %c0 = arith.constant 0 : index
    %c0_1 = arith.constant 0 : index
    %c0_2 = arith.constant 0 : index
    %3 = vector.load %arg13[%c0, %c0_1, %c0_2] : memref<2x16x128xbf16, #tpu.memory_space<vmem>>, vector<1x16x128xbf16>
    %4 = vector.shape_cast %3 : vector<1x16x128xbf16> to vector<16x128xbf16>
    %c0_3 = arith.constant 0 : index
    %c0_4 = arith.constant 0 : index
    %5 = vector.load %arg7[%c0_3, %c0_4] : memref<128x128xbf16, #tpu.memory_space<vmem>>, vector<128x128xbf16>
    %cst = arith.constant dense<0.000000e+00> : vector<16x128xf32>
    %6 = tpu.matmul %4, %5, %cst {dimension_numbers = #tpu.dot_dimension_numbers<[1], [0], [0], [1], [0, 0, 1, 1], [], []>} : vector<16x128xbf16>, vector<128x128xbf16>, vector<16x128xf32> -> vector<16x128xf32>
    %c0_5 = arith.constant 0 : index
    %c0_6 = arith.constant 0 : index
    %7 = vector.load %arg8[%c0_5, %c0_6] : memref<1x128xf32, #tpu.memory_space<vmem>>, vector<1x128xf32>
    %8 = vector.broadcast %7 : vector<1x128xf32> to vector<16x128xf32>
    %9 = arith.addf %6, %8 : vector<16x128xf32>
    %c1 = arith.constant 1 : index
    %c0_7 = arith.constant 0 : index
    %c0_8 = arith.constant 0 : index
    %10 = vector.load %arg13[%c1, %c0_7, %c0_8] : memref<2x16x128xbf16, #tpu.memory_space<vmem>>, vector<1x16x128xbf16>
    %11 = vector.shape_cast %10 : vector<1x16x128xbf16> to vector<16x128xbf16>
    %c0_9 = arith.constant 0 : index
    %c0_10 = arith.constant 0 : index
    %12 = vector.load %arg9[%c0_9, %c0_10] : memref<128x128xbf16, #tpu.memory_space<vmem>>, vector<128x128xbf16>
    %cst_11 = arith.constant dense<0.000000e+00> : vector<16x128xf32>
    %13 = tpu.matmul %11, %12, %cst_11 {dimension_numbers = #tpu.dot_dimension_numbers<[1], [0], [0], [1], [0, 0, 1, 1], [], []>} : vector<16x128xbf16>, vector<128x128xbf16>, vector<16x128xf32> -> vector<16x128xf32>
    %c0_12 = arith.constant 0 : index
    %c0_13 = arith.constant 0 : index
    %14 = vector.load %arg10[%c0_12, %c0_13] : memref<1x128xf32, #tpu.memory_space<vmem>>, vector<1x128xf32>
    %15 = vector.broadcast %14 : vector<1x128xf32> to vector<16x128xf32>
    %16 = arith.addf %13, %15 : vector<16x128xf32>
    %c0_14 = arith.constant 0 : index
    %c0_15 = arith.constant 0 : index
    %17 = vector.load %arg12[%c0_14, %c0_15] : memref<16x128xf32, #tpu.memory_space<vmem>>, vector<16x128xf32>
    tpu.vector_store %arg12[%c0_14, %c0_15], %9 {strides = array<i32>} : memref<16x128xf32, #tpu.memory_space<vmem>>, vector<16x128xf32>,
    %18 = arith.addf %9, %16 : vector<16x128xf32>
    %c0_16 = arith.constant 0 : index
    %c0_17 = arith.constant 0 : index
    %19 = vector.load %arg11[%c0_16, %c0_17] : memref<16x128xf32, #tpu.memory_space<vmem>>, vector<16x128xf32>
    tpu.vector_store %arg11[%c0_16, %c0_17], %18 {strides = array<i32>} : memref<16x128xf32, #tpu.memory_space<vmem>>, vector<16x128xf32>,
    return
  }
  func.func @transform_0(%arg0: i32, %arg1: i32) -> (i32, i32) {
    %c0_i32 = arith.constant 0 : i32
    %c0_i32_0 = arith.constant 0 : i32
    return %arg0, %c0_i32 : i32, i32
  }
  func.func @transform_1(%arg0: i32, %arg1: i32) -> (i32, i32) {
    %c0_i32 = arith.constant 0 : i32
    %c0_i32_0 = arith.constant 0 : i32
    %c0_i32_1 = arith.constant 0 : i32
    return %c0_i32, %c0_i32_0 : i32, i32
  }
  func.func @transform_2(%arg0: i32, %arg1: i32) -> (i32, i32) {
    %c0_i32 = arith.constant 0 : i32
    %c0_i32_0 = arith.constant 0 : i32
    %c0_i32_1 = arith.constant 0 : i32
    return %c0_i32, %c0_i32_0 : i32, i32
  }
  func.func @transform_3(%arg0: i32, %arg1: i32) -> (i32, i32) {
    %c0_i32 = arith.constant 0 : i32
    %c0_i32_0 = arith.constant 0 : i32
    %c0_i32_1 = arith.constant 0 : i32
    return %c0_i32, %c0_i32_0 : i32, i32
  }
  func.func @transform_4(%arg0: i32, %arg1: i32) -> (i32, i32) {
    %c0_i32 = arith.constant 0 : i32
    %c0_i32_0 = arith.constant 0 : i32
    %c0_i32_1 = arith.constant 0 : i32
    return %c0_i32, %c0_i32_0 : i32, i32
  }
  func.func @transform_5(%arg0: i32, %arg1: i32) -> (i32, i32) {
    %c0_i32 = arith.constant 0 : i32
    %c0_i32_0 = arith.constant 0 : i32
    return %c0_i32, %arg1 : i32, i32
  }
  func.func @transform_6(%arg0: i32, %arg1: i32) -> (i32, i32) {
    %c0_i32 = arith.constant 0 : i32
    %c0_i32_0 = arith.constant 0 : i32
    return %c0_i32, %arg1 : i32, i32
  }
  func.func @transform_7(%arg0: i32, %arg1: i32) -> (i32, i32) {
    %c0_i32 = arith.constant 0 : i32
    %c0_i32_0 = arith.constant 0 : i32
    return %c0_i32, %arg1 : i32, i32
  }
  func.func @transform_8(%arg0: i32, %arg1: i32) -> (i32, i32) {
    %c0_i32 = arith.constant 0 : i32
    %c0_i32_0 = arith.constant 0 : i32
    return %c0_i32, %arg1 : i32, i32
  }
  func.func @transform_9(%arg0: i32, %arg1: i32) -> (i32, i32) {
    %c0_i32 = arith.constant 0 : i32
    return %arg0, %arg1 : i32, i32
  }
  func.func @transform_10(%arg0: i32, %arg1: i32) -> (i32, i32) {
    %c0_i32 = arith.constant 0 : i32
    return %arg0, %arg1 : i32, i32
  }
}

</mosaic_0001>

<bundles_post_ra>
// kernel: tpu_custom_call.1
= control target key start
LH: loop header
LB: loop body
LE: loop exit
PB: predicated region body
PF: predicated region fallthrough
CT: control target
= control target key end

     0   :  { %16 = vsyncpa [#allocation4], 0  ;;  %s1357_s0 = inlined_call_operand.hbm [shape: bf16[16,32], index: 0, kind: input, shape index: {}]   ;;  %s1358_s1 = inlined_call_operand.hbm [shape: bf16[32,128], index: 1, kind: input, shape index: {}]   ;;  %s1359_s2 = inlined_call_operand.hbm [shape: f32[1,128], index: 2, kind: input, shape index: {}]   ;;  %s1360_s3 = inlined_call_operand.hbm [shape: bf16[128,256], index: 3, kind: input, shape index: {}]   ;;  %s1361_s4 = inlined_call_operand.hbm [shape: f32[1,256], index: 4, kind: input, shape index: {}]   ;;  %s1362_s5 = inlined_call_operand.hbm [shape: bf16[128,128], index: 5, kind: input, shape index: {}]   ;;  %s1363_s6 = inlined_call_operand.hbm [shape: f32[1,128], index: 6, kind: input, shape index: {}]   ;;  %s1364_s7 = inlined_call_operand.hbm [shape: bf16[128,128], index: 7, kind: input, shape index: {}]   ;;  %s1365_s8 = inlined_call_operand.hbm [shape: f32[1,128], index: 8, kind: input, shape index: {}]   ;;  %s1366_s9 = inlined_call_operand.hbm [shape: f32[16,128], index: 9, kind: output, shape index: {0}]   ;;  %s1367_s10 = inlined_call_operand.hbm [shape: f32[16,128], index: 10, kind: output, shape index: {1}]  }
   0x1   :  { %17 = vsyncpa [#allocation7], 0 }
   0x2   :  { %18 = vsyncpa [#allocation10], 0 }
   0x3   :  { %19 = vsyncpa [#allocation13], 0 }
   0x4   :  { %20 = vsyncpa [#allocation16], 0 }
   0x5   :  { %21 = vsyncpa [#allocation5], 0 }
   0x6   :  { %22 = vsyncpa [#allocation20], 0  ;;  %s1086_s13 = smov [#allocation6]   ;;  %s1087_s15 = smov [#allocation9]  }
   0x7   :  { %s40_s14 = sshll.u32 %s1086_s13, 4  ;;  %s62_s16 = sshll.u32 %s1087_s15, 4  ;;  %s41_s14 = int_to_ptr.vmem [resolvable:$true] %s40_s14  ;;  %s1159_s16 = int_to_ptr.vmem [resolvable:$true] %s62_s16 }
   0x8   :  { %s830_s19 = scalar_lea.hbm %s1358_s1, 256 }
   0x9   :  { %p831_p0 = scmp.ne.s32.totalorder %s1358_s1, %s830_s19  ;;  %p834_p1 = scmp.lt.u32.totalorder %s830_s19, %s1358_s1 }
   0xb   :  { %p836_p2 = pnand %p834_p1, %p831_p0 }
   0xd   :  { %839 = shalt.err (!%p836_p2)
}
   0xe   :  { %s840_s24 = scalar_lea.vmem %s41_s14, 256  ;;  %p845_p4 = scmp.lt.s32.totalorder %s41_s14, %s41_s14 }
   0xf   :  { %p841_p3 = scmp.ne.s32.totalorder %s41_s14, %s840_s24  ;;  %p846_p5 = scmp.lt.s32.totalorder %s840_s24, %s840_s24 }
  0x11   :  { %p847_p6 = por %p846_p5, %p845_p4 }
  0x13   :  { %p848_p7 = pnand %p847_p6, %p841_p3 }
  0x15   :  { %851 = shalt.err (!%p848_p7)
}
  0x16   :  { %s1088_s25 = smov 64   ;;  %s1089_s26 = smov 4  }
  0x17   :  { %46 = dma.hbm_to_vmem [thread:$0]  %s1358_s1, 256, %s41_s14, [#allocation7], %s1088_s25, %s1088_s25, %s1089_s26  }
  0x18   :  { %s852_s11 = scalar_lea.hbm %s1360_s3, 2048 }
  0x19   :  { %p853_p8 = scmp.ne.s32.totalorder %s1360_s3, %s852_s11  ;;  %p856_p9 = scmp.lt.u32.totalorder %s852_s11, %s1360_s3 }
  0x1b   :  { %p858_p10 = pnand %p856_p9, %p853_p8 }
  0x1d   :  { %861 = shalt.err (!%p858_p10)
}
  0x1e   :  { %s862_s18 = scalar_lea.vmem %s1159_s16, 2048  ;;  %p867_p12 = scmp.lt.s32.totalorder %s1159_s16, %s1159_s16 }
  0x1f   :  { %p863_p11 = scmp.ne.s32.totalorder %s1159_s16, %s862_s18  ;;  %p868_p13 = scmp.lt.s32.totalorder %s862_s18, %s862_s18 }
  0x21   :  { %p869_p0 = por %p868_p13, %p867_p12 }
  0x23   :  { %p870_p1 = pnand %p869_p0, %p863_p11 }
  0x25   :  { %873 = shalt.err (!%p870_p1)
}
  0x26   :  { %s1090_s1 = smov 128   ;;  %s1091_s14 = smov 8  }
  0x27   :  { %68 = dma.hbm_to_vmem [thread:$0]  %s1360_s3, 2048, %s1159_s16, [#allocation10], %s1090_s1, %s1090_s1, %s1091_s14  }
  0x28   :  { %s1092_s21 = smov [#allocation12]   ;;  %s1093_s23 = smov [#allocation15]  }
  0x29   :  { %s84_s22 = sshll.u32 %s1092_s21, 4  ;;  %s106_s24 = sshll.u32 %s1093_s23, 4  ;;  %s85_s22 = int_to_ptr.vmem [resolvable:$true] %s84_s22  ;;  %s1196_s24 = int_to_ptr.vmem [resolvable:$true] %s106_s24 }
  0x2a   :  { %s874_s29 = scalar_lea.hbm %s1362_s5, 1024 }
  0x2b   :  { %p875_p2 = scmp.ne.s32.totalorder %s1362_s5, %s874_s29  ;;  %p878_p3 = scmp.lt.u32.totalorder %s874_s29, %s1362_s5 }
  0x2d   :  { %p880_p4 = pnand %p878_p3, %p875_p2 }
  0x2f   :  { %883 = shalt.err (!%p880_p4)
}
  0x30   :  { %s884_s3 = scalar_lea.vmem %s85_s22, 1024  ;;  %p889_p6 = scmp.lt.s32.totalorder %s85_s22, %s85_s22 }
  0x31   :  { %p885_p5 = scmp.ne.s32.totalorder %s85_s22, %s884_s3  ;;  %p890_p7 = scmp.lt.s32.totalorder %s884_s3, %s884_s3 }
  0x33   :  { %p891_p8 = por %p890_p7, %p889_p6 }
  0x35   :  { %p892_p9 = pnand %p891_p8, %p885_p5 }
  0x37   :  { %895 = shalt.err (!%p892_p9)
}
  0x38   :  { %90 = dma.hbm_to_vmem [thread:$0]  %s1362_s5, 1024, %s85_s22, [#allocation13], %s1088_s25, %s1088_s25, %s1089_s26  }
  0x39   :  { %s896_s19 = scalar_lea.hbm %s1364_s7, 1024 }
  0x3a   :  { %p897_p10 = scmp.ne.s32.totalorder %s1364_s7, %s896_s19  ;;  %p900_p11 = scmp.lt.u32.totalorder %s896_s19, %s1364_s7 }
  0x3c   :  { %p902_p12 = pnand %p900_p11, %p897_p10 }
  0x3e   :  { %905 = shalt.err (!%p902_p12)
}
  0x3f   :  { %s906_s28 = scalar_lea.vmem %s1196_s24, 1024  ;;  %p911_p0 = scmp.lt.s32.totalorder %s1196_s24, %s1196_s24 }
  0x40   :  { %p907_p13 = scmp.ne.s32.totalorder %s1196_s24, %s906_s28  ;;  %p912_p1 = scmp.lt.s32.totalorder %s906_s28, %s906_s28 }
  0x42   :  { %p913_p2 = por %p912_p1, %p911_p0 }
  0x44   :  { %p914_p3 = pnand %p913_p2, %p907_p13 }
  0x46   :  { %917 = shalt.err (!%p914_p3)
}
  0x47   :  { %112 = dma.hbm_to_vmem [thread:$0]  %s1364_s7, 1024, %s1196_s24, [#allocation16], %s1088_s25, %s1088_s25, %s1089_s26  }
  0x48   :  { %s1094_s29 = smov [#allocation3]   ;;  %s1095_s11 = smov [#allocation8]  }
  0x49   :  { %s28_s30 = sshll.u32 %s1094_s29, 4  ;;  %s53_s12 = sshll.u32 %s1095_s11, 4  ;;  %s29_s30 = int_to_ptr.vmem [resolvable:$true] %s28_s30  ;;  %s54_s12 = int_to_ptr.vmem [resolvable:$true] %s53_s12 }
  0x4a   :  { %s918_s16 = scalar_lea.hbm %s1357_s0, 128 }
  0x4b   :  { %p919_p4 = scmp.ne.s32.totalorder %s1357_s0, %s918_s16  ;;  %p922_p5 = scmp.lt.u32.totalorder %s918_s16, %s1357_s0 }
  0x4d   :  { %p924_p6 = pnand %p922_p5, %p919_p4 }
  0x4f   :  { %927 = shalt.err (!%p924_p6)
}
  0x50   :  { %s928_s7 = scalar_lea.vmem %s29_s30, 128  ;;  %p933_p8 = scmp.lt.s32.totalorder %s29_s30, %s29_s30 }
  0x51   :  { %p929_p7 = scmp.ne.s32.totalorder %s29_s30, %s928_s7  ;;  %p934_p9 = scmp.lt.s32.totalorder %s928_s7, %s928_s7 }
  0x53   :  { %p935_p10 = por %p934_p9, %p933_p8 }
  0x55   :  { %p936_p11 = pnand %p935_p10, %p929_p7 }
  0x57   :  { %939 = shalt.err (!%p936_p11)
}
  0x58   :  { %34 = dma.hbm_to_vmem [thread:$0]  %s1357_s0, 128, %s29_s30, [#allocation4], %s1088_s25, %s1088_s25, %s1089_s26  }
  0x59   :  { %s940_s27 = scalar_lea.hbm %s1359_s2, 16 }
  0x5a   :  { %p941_p12 = scmp.ne.s32.totalorder %s1359_s2, %s940_s27  ;;  %p944_p13 = scmp.lt.u32.totalorder %s940_s27, %s1359_s2 }
  0x5c   :  { %p946_p0 = pnand %p944_p13, %p941_p12 }
  0x5e   :  { %949 = shalt.err (!%p946_p0)
}
  0x5f   :  { %s950_s11 = scalar_lea.vmem %s54_s12, 16  ;;  %s954_s13 = scalar_lea.vmem %s54_s12, 32 }
  0x60   :  { %p951_p1 = scmp.ne.s32.totalorder %s54_s12, %s950_s11  ;;  %p955_p2 = scmp.lt.s32.totalorder %s54_s12, %s54_s12 }
  0x61   :  { %p956_p3 = scmp.lt.s32.totalorder %s954_s13, %s950_s11 }
  0x63   :  { %p957_p4 = por %p956_p3, %p955_p2 }
  0x65   :  { %p958_p5 = pnand %p957_p4, %p951_p1 }
  0x67   :  { %961 = shalt.err (!%p958_p5)
}
  0x68   :  { %56 = dma.hbm_to_vmem [thread:$0]  %s1359_s2, 16, %s54_s12, [#allocation7]  }
  0x69   :  { %s1096_s26 = smov [#allocation11]   ;;  %s1097_s3 = smov [#allocation14]  }
  0x6a   :  { %s75_s30 = sshll.u32 %s1096_s26, 4  ;;  %s97_s16 = sshll.u32 %s1097_s3, 4  ;;  %s76_s30 = int_to_ptr.vmem [resolvable:$true] %s75_s30  ;;  %s98_s16 = int_to_ptr.vmem [resolvable:$true] %s97_s16 }
  0x6b   :  { %s962_s18 = scalar_lea.hbm %s1361_s4, 32 }
  0x6c   :  { %p963_p6 = scmp.ne.s32.totalorder %s1361_s4, %s962_s18  ;;  %p966_p7 = scmp.lt.u32.totalorder %s962_s18, %s1361_s4 }
  0x6e   :  { %p968_p8 = pnand %p966_p7, %p963_p6 }
  0x70   :  { %971 = shalt.err (!%p968_p8)
}
  0x71   :  { %s972_s2 = scalar_lea.vmem %s76_s30, 32  ;;  %p977_p10 = scmp.lt.s32.totalorder %s76_s30, %s76_s30 }
  0x72   :  { %p973_p9 = scmp.ne.s32.totalorder %s76_s30, %s972_s2  ;;  %p978_p11 = scmp.lt.s32.totalorder %s972_s2, %s972_s2 }
  0x74   :  { %p979_p12 = por %p978_p11, %p977_p10 }
  0x76   :  { %p980_p13 = pnand %p979_p12, %p973_p9 }
  0x78   :  { %983 = shalt.err (!%p980_p13)
}
  0x79   :  { %78 = dma.hbm_to_vmem [thread:$0]  %s1361_s4, 32, %s76_s30, [#allocation10]  }
  0x7a   :  { %s984_s28 = scalar_lea.hbm %s1363_s6, 16 }
  0x7b   :  { %p985_p0 = scmp.ne.s32.totalorder %s1363_s6, %s984_s28  ;;  %p988_p1 = scmp.lt.u32.totalorder %s984_s28, %s1363_s6 }
  0x7d   :  { %p990_p2 = pnand %p988_p1, %p985_p0 }
  0x7f   :  { %993 = shalt.err (!%p990_p2)
}
  0x80   :  { %s994_s13 = scalar_lea.vmem %s98_s16, 16  ;;  %s998_s0 = scalar_lea.vmem %s98_s16, 32 }
  0x81   :  { %p995_p3 = scmp.ne.s32.totalorder %s98_s16, %s994_s13  ;;  %p999_p4 = scmp.lt.s32.totalorder %s98_s16, %s98_s16 }
  0x82   :  { %p1000_p5 = scmp.lt.s32.totalorder %s998_s0, %s994_s13 }
  0x84   :  { %p1001_p6 = por %p1000_p5, %p999_p4 }
  0x86   :  { %p1002_p7 = pnand %p1001_p6, %p995_p3 }
  0x88   :  { %1005 = shalt.err (!%p1002_p7)
}
  0x89   :  { %100 = dma.hbm_to_vmem [thread:$0]  %s1363_s6, 16, %s98_s16, [#allocation13]  }
  0x8a   :  { %s1098_s26 = smov [#allocation17]   ;;  %s1006_s17 = scalar_lea.hbm %s1365_s8, 16 }
  0x8b   :  { %s119_s30 = sshll.u32 %s1098_s26, 4  ;;  %p1007_p8 = scmp.ne.s32.totalorder %s1365_s8, %s1006_s17  ;;  %s120_s30 = int_to_ptr.vmem [resolvable:$true] %s119_s30 }
  0x8c   :  { %p1010_p9 = scmp.lt.u32.totalorder %s1006_s17, %s1365_s8 }
  0x8e   :  { %p1012_p10 = pnand %p1010_p9, %p1007_p8 }
  0x90   :  { %1015 = shalt.err (!%p1012_p10)
}
  0x91   :  { %s1016_s20 = scalar_lea.vmem %s120_s30, 16  ;;  %s1020_s6 = scalar_lea.vmem %s120_s30, 32 }
  0x92   :  { %p1017_p11 = scmp.ne.s32.totalorder %s120_s30, %s1016_s20  ;;  %p1021_p12 = scmp.lt.s32.totalorder %s120_s30, %s120_s30 }
  0x93   :  { %p1022_p13 = scmp.lt.s32.totalorder %s1020_s6, %s1016_s20 }
  0x95   :  { %p1023_p0 = por %p1022_p13, %p1021_p12 }
  0x97   :  { %p1024_p1 = pnand %p1023_p0, %p1017_p11 }
  0x99   :  { %1027 = shalt.err (!%p1024_p1)
}
  0x9a   :  { %122 = dma.hbm_to_vmem [thread:$0]  %s1365_s8, 16, %s120_s30, [#allocation16]  }
  0x9b   :  { %1072 = dma.done.wait [#allocation4], 128  }
  0x9c   :  { %1073 = vsyncadd [#allocation4], 4294967168 }
  0x9d   :  { %1074 = dma.done.wait [#allocation7], 272  }
  0x9e   :  { %1075 = vsyncadd [#allocation7], 4294967024 }
  0x9f   :  { %1076 = dma.done.wait [#allocation10], 2080  }
  0xa0   :  { %1077 = vsyncadd [#allocation10], 4294965216 }
  0xa1   :  { %1078 = dma.done.wait [#allocation13], 1040  }
  0xa2   :  { %1079 = vsyncadd [#allocation13], 4294966256 }
  0xa3   :  { %1080 = dma.done.wait [#allocation16], 1040  }
  0xa4   :  { %1081 = vsyncadd [#allocation16], 4294966256  ;;  %v1099_v0 = vmov 0.0   ;;  %vm1100_vm0 = vmmov 0   ;;  %v787_v1 = vld [vmem:[#allocation6] sm:$0xff]   ;;  %v788_v2 = vld [vmem:[#allocation6 + $0x8] sm:$0xff]   ;;  %v249_v45 = vlaneseq }
  0xa5   :  { %721 = vmatprep.subr.bf16.mxu0 %v1099_v0  ;;  %725 = vmatprep.mubr.msk.bf16.mxu0 %vm1100_vm0, %v1099_v0  ;;  %v790_v3 = vld [vmem:[#allocation9 + $0x4] ss:$8 sps:$4 sm:$0xff]   ;;  %v792_v4 = vld [vmem:[#allocation9] ss:$8 sps:$4 sm:$0xff]   ;;  %v793_v6 = vld [vmem:[#allocation9 + $0x14] ss:$8 sps:$4 sm:$0xff]  }
  0xa6   :  { %722 = vmatpush3.bf16.msra.mxu0 %v787_v1  ;;  %v789_v5 = vld [vmem:[#allocation3] sm:$0xff]   ;;  %339 = vmatprep.subr.bf16.mxu1 %v790_v3  ;;  %vm185_vm1 = vcmask 261120   ;;  %v795_v7 = vld [vmem:[#allocation9 + $0x10] ss:$8 sps:$4 sm:$0xff]   ;;  %v799_v10 = vld [vmem:[#allocation9 + $0x34] ss:$8 sps:$4 sm:$0xff]  }
  0xa7   :  { %723 = vmatprep.subr.bf16.mxu0 %v1099_v0  ;;  %340 = vmatpush1.bf16.msra.mxu1 %v792_v4  ;;  %v796_v8 = vld [vmem:[#allocation9 + $0x24] ss:$8 sps:$4 sm:$0xff]   ;;  %v798_v9 = vld [vmem:[#allocation9 + $0x20] ss:$8 sps:$4 sm:$0xff]   ;;  %v801_v11 = vld [vmem:[#allocation9 + $0x30] ss:$8 sps:$4 sm:$0xff]  }
  0xa8   :  { %341 = vmatprep.subr.bf16.mxu1 %v793_v6  ;;  %v802_v12 = vld [vmem:[#allocation9 + $0x44] ss:$8 sps:$4 sm:$0xff]   ;;  %v804_v13 = vld [vmem:[#allocation9 + $0x40] ss:$8 sps:$4 sm:$0xff]   ;;  %v805_v14 = vld [vmem:[#allocation9 + $0x54] ss:$8 sps:$4 sm:$0xff]  }
  0xa9   :  { %v807_v15 = vld [vmem:[#allocation9 + $0x50] ss:$8 sps:$4 sm:$0xff]   ;;  %v808_v16 = vld [vmem:[#allocation9 + $0x64] ss:$8 sps:$4 sm:$0xff]   ;;  %v810_v17 = vld [vmem:[#allocation9 + $0x60] ss:$8 sps:$4 sm:$0xff]  }
  0xaa   :  { %724 = vmatpush3.bf16.msra.mxu0 %v788_v2  ;;  %v811_v18 = vld [vmem:[#allocation9 + $0x74] ss:$8 sps:$4 sm:$0xff]   ;;  %v813_v19 = vld [vmem:[#allocation9 + $0x70] ss:$8 sps:$4 sm:$0xff]   ;;  %v1101_v20 = vmov 0   ;;  %v814_v21 = vld [vmem:[#allocation12] sm:$0xff]  }
  0xab   :  { %729 = vmatprep.subr.bf16.mxu0 %v1099_v0  ;;  %342 = vmatpush1.bf16.msra.mxu1 %v795_v7  ;;  %v816_v22 = vld [vmem:[#allocation12 + $0x8] sm:$0xff]   ;;  %v818_v23 = vld [vmem:[#allocation12 + $0x10] sm:$0xff]   ;;  %v820_v24 = vld [vmem:[#allocation12 + $0x18] sm:$0xff]   ;;  %v250_v46 = vshrl.u32 %v249_v45, 7  ;;  %s1102_s8 = smov [#allocation19]   ;;  %s1103_s21 = smov [#allocation18]  }
  0xac   :  { %343 = vmatprep.subr.bf16.mxu1 %v796_v8  ;;  %371 = vmatprep.mubr.bf16.mxu1 %v1101_v20  ;;  %v822_v25 = vld [vmem:[#allocation12 + $0x20] sm:$0xff]   ;;  %v824_v26 = vld [vmem:[#allocation12 + $0x28] sm:$0xff]   ;;  %v661_v27 = vld [vmem:[#allocation8] ss:$0 sm:$0xff]  ;;  %s641_s12 = sshll.u32 %s1102_s8, 4  ;;  %s629_s23 = sshll.u32 %s1103_s21, 4  ;;  %s642_s12 = int_to_ptr.vmem [resolvable:$true] %s641_s12  ;;  %s1320_s23 = int_to_ptr.vmem [resolvable:$true] %s629_s23 }
  0xad   :  { %726 = vmatmul.mubr.msk.bf16.vlgmr.msra.gmra.mrb[0].mxu0 %vm185_vm1, %v789_v5  ;;  %v815_v34 = vld [vmem:[#allocation15] sm:$0xff]   ;;  %v817_v36 = vld [vmem:[#allocation15 + $0x8] sm:$0xff]   ;;  %v819_v37 = vld [vmem:[#allocation15 + $0x10] sm:$0xff]   ;;  %v251_v47 = vsub.s32 0, %v250_v46  ;;  %v255_v49 = vsub.s32 1, %v250_v46  ;;  %s1028_s27 = scalar_lea.vmem %s642_s12, 256  ;;  %p1033_p3 = scmp.lt.s32.totalorder %s642_s12, %s642_s12 }
  0xae   :  { %745 = vmatprep.mubr.msk.bf16.mxu0 %vm1100_vm0, %v1099_v0  ;;  %730 = vmatpush3.bf16.msra.mxu0 %v814_v21  ;;  %v821_v38 = vld [vmem:[#allocation15 + $0x18] sm:$0xff]   ;;  %v823_v39 = vld [vmem:[#allocation15 + $0x20] sm:$0xff]   ;;  %v825_v40 = vld [vmem:[#allocation15 + $0x28] sm:$0xff]   ;;  %p1029_p2 = scmp.ne.s32.totalorder %s642_s12, %s1028_s27  ;;  %p1034_p4 = scmp.lt.s32.totalorder %s1028_s27, %s1028_s27 }
  0xaf   :  { %344 = vmatpush1.bf16.msra.mxu1 %v798_v9  ;;  %731 = vmatprep.subr.bf16.mxu0 %v1099_v0  ;;  %v826_v41 = vld [vmem:[#allocation12 + $0x30] sm:$0xff]   ;;  %v828_v43 = vld [vmem:[#allocation12 + $0x38] sm:$0xff]   ;;  %v682_v2 = vld [vmem:[#allocation14] ss:$0 sm:$0xff] }
  0xb0   :  { %345 = vmatprep.subr.bf16.mxu1 %v799_v10  ;;  %v827_v42 = vld [vmem:[#allocation15 + $0x30] sm:$0xff]   ;;  %v829_v44 = vld [vmem:[#allocation15 + $0x38] sm:$0xff]   ;;  %v691_v3 = vld [vmem:[#allocation17] ss:$0 sm:$0xff]  ;;  %p1035_p5 = por %p1034_p4, %p1033_p3 }
  0xb1   :  { %v247_v48 = vld [vmem:[#allocation11] sm:$0x3] }
  0xb2   :  { %732 = vmatpush3.bf16.msra.mxu0 %v816_v22  ;;  %v252_v50 = vrot.slane %v247_v48, %v251_v47  ;;  %v256_v51 = vrot.slane %v247_v48, %v255_v49  ;;  %p1036_p6 = pnand %p1035_p5, %p1029_p2 }
  0xb3   :  { %346 = vmatpush1.bf16.msra.mxu1 %v801_v11  ;;  %733 = vmatprep.subr.bf16.mxu0 %v1099_v0 }
  0xb4   :  { %347 = vmatprep.subr.bf16.mxu1 %v802_v12 }
  0xb6   :  { %734 = vmatpush3.bf16.msra.mxu0 %v818_v23 }
  0xb7   :  { %348 = vmatpush1.bf16.msra.mxu1 %v804_v13  ;;  %735 = vmatprep.subr.bf16.mxu0 %v1099_v0 }
  0xb8   :  { %349 = vmatprep.subr.bf16.mxu1 %v805_v14 }
  0xba   :  { %736 = vmatpush3.bf16.msra.mxu0 %v820_v24 }
  0xbb   :  { %350 = vmatpush1.bf16.msra.mxu1 %v807_v15  ;;  %737 = vmatprep.subr.bf16.mxu0 %v1099_v0 }
  0xbc   :  { %351 = vmatprep.subr.bf16.mxu1 %v808_v16 }
  0xbe   :  { %738 = vmatpush3.bf16.msra.mxu0 %v822_v25 }
  0xbf   :  { %352 = vmatpush1.bf16.msra.mxu1 %v810_v17  ;;  %739 = vmatprep.subr.bf16.mxu0 %v1099_v0 }
  0xc0   :  { %353 = vmatprep.subr.bf16.mxu1 %v811_v18 }
  0xc2   :  { %740 = vmatpush3.bf16.msra.mxu0 %v824_v26 }
  0xc3   :  { %354 = vmatpush1.bf16.msra.mxu1 %v813_v19  ;;  %741 = vmatprep.subr.bf16.mxu0 %v1099_v0 }
  0xc4   :  { %749 = vmatprep.subr.bf16.mxu1 %v1099_v0 }
  0xc6   :  { %742 = vmatpush3.bf16.msra.mxu0 %v826_v41 }
  0xc7   :  { %743 = vmatprep.subr.bf16.mxu0 %v1099_v0 }
  0xca   :  { %744 = vmatpush3.bf16.msra.mxu0 %v828_v43 }
 0x180   :  { %v223_v28 = vpop.f32.mrb[0].mxu0 }
 0x181   :  { %v727_v29 = vpop.f32.mrb[1].mxu0  ;;  %v224_v31 = vadd.f32 %v661_v27, %v223_v28 }
 0x182   :  { %v226_v30 = vpop.f32.mrb[2].mxu0 }
 0x183   :  { %v227_v32 = vadd.f32 %v661_v27, %v226_v30  ;;  %v728_v33 = vpop.f32.mrb[3].mxu0 }
 0x185   :  { %v230_v35 = vpack.c.bf16 %v227_v32, %v224_v31 }
 0x187   :  { %372 = vmatmul.mubr.bf16.vlgmr.msra.gmra.mrb[0].mxu1 %v230_v35 }
 0x188   :  { %750 = vmatpush3.bf16.msra.mxu1 %v815_v34  ;;  %765 = vmatprep.mubr.msk.bf16.mxu1 %vm1100_vm0, %v1099_v0 }
 0x189   :  { %751 = vmatprep.subr.bf16.mxu1 %v1099_v0 }
 0x18c   :  { %752 = vmatpush3.bf16.msra.mxu1 %v817_v36 }
 0x18d   :  { %753 = vmatprep.subr.bf16.mxu1 %v1099_v0 }
 0x190   :  { %754 = vmatpush3.bf16.msra.mxu1 %v819_v37 }
 0x191   :  { %755 = vmatprep.subr.bf16.mxu1 %v1099_v0 }
 0x194   :  { %756 = vmatpush3.bf16.msra.mxu1 %v821_v38 }
 0x195   :  { %757 = vmatprep.subr.bf16.mxu1 %v1099_v0 }
 0x198   :  { %758 = vmatpush3.bf16.msra.mxu1 %v823_v39 }
 0x199   :  { %759 = vmatprep.subr.bf16.mxu1 %v1099_v0 }
 0x19c   :  { %760 = vmatpush3.bf16.msra.mxu1 %v825_v40 }
 0x19d   :  { %761 = vmatprep.subr.bf16.mxu1 %v1099_v0 }
 0x1a0   :  { %762 = vmatpush3.bf16.msra.mxu1 %v827_v42 }
 0x1a1   :  { %763 = vmatprep.subr.bf16.mxu1 %v1099_v0 }
 0x1a4   :  { %764 = vmatpush3.bf16.msra.mxu1 %v829_v44 }
 0x25a   :  { %v373_v52 = vpop.f32.mrb[0].mxu1 }
 0x25b   :  { %v374_v53 = vadd.f32 %v373_v52, %v252_v50  ;;  %v375_v54 = vpop.f32.mrb[1].mxu1 }
 0x25c   :  { %v376_v55 = vadd.f32 %v375_v54, %v256_v51  ;;  %v377_v56 = vpop.f32.mrb[2].mxu1 }
 0x25d   :  { %v378_v57 = vadd.f32 %v377_v56, %v252_v50  ;;  %v379_v58 = vpop.f32.mrb[3].mxu1  ;;  %v382_v60 = vmax.f32 %v374_v53, 0.0 }
 0x25e   :  { %v380_v59 = vadd.f32 %v379_v58, %v256_v51  ;;  %v383_v62 = vmax.f32 %v376_v55, 0.0 }
 0x25f   :  { %v384_v61 = vmax.f32 %v378_v57, 0.0 }
 0x260   :  { %v385_v63 = vmax.f32 %v380_v59, 0.0 }
 0x261   :  { %v386_v0 = vpack.c.bf16 %v384_v61, %v382_v60 }
 0x262   :  { %v387_v1 = vpack.c.bf16 %v385_v63, %v383_v62 }
 0x263   :  { %746 = vmatmul.mubr.bf16.vlgmr.msra.gmra.mrb[4].mxu0 %v386_v0 }
 0x264   :  { %766 = vmatmul.mubr.bf16.vlgmr.msra.gmra.mrb[4].mxu1 %v387_v1 }
 0x336   :  { %v497_v4 = vpop.f32.mrb[4].mxu0 }
 0x337   :  { %v498_v5 = vadd.f32 %v682_v2, %v497_v4  ;;  %v747_v6 = vpop.f32.mrb[5].mxu0  ;;  %v611_v7 = vpop.f32.mrb[4].mxu1 }
 0x338   :  { %v612_v8 = vadd.f32 %v691_v3, %v611_v7  ;;  %v500_v9 = vpop.f32.mrb[6].mxu0  ;;  %v767_v10 = vpop.f32.mrb[5].mxu1 }
 0x339   :  { %618 = vst [vmem:[#allocation19] sm:$0xff] %v498_v5  ;;  %v501_v11 = vadd.f32 %v682_v2, %v500_v9  ;;  %v748_v12 = vpop.f32.mrb[7].mxu0  ;;  %v614_v13 = vpop.f32.mrb[6].mxu1 }
 0x33a   :  { %v620_v14 = vadd.f32 %v612_v8, %v498_v5  ;;  %v615_v15 = vadd.f32 %v691_v3, %v614_v13  ;;  %v768_v16 = vpop.f32.mrb[7].mxu1 }
 0x33b   :  { %619 = vst [vmem:[#allocation19 + $0x8] sm:$0xff] %v501_v11 }
 0x33c   :  { %622 = vst [vmem:[#allocation18] sm:$0xff] %v620_v14  ;;  %v621_v17 = vadd.f32 %v615_v15, %v501_v11 }
 0x33d   :  { %1039 = shalt.err (!%p1036_p6)
}
 0x33e   :  { %s1040_s22 = scalar_lea.hbm %s1367_s10, 256 }
 0x33f   :  { %p1041_p7 = scmp.ne.s32.totalorder %s1367_s10, %s1040_s22  ;;  %p1044_p8 = scmp.lt.u32.totalorder %s1040_s22, %s1367_s10 }
 0x341   :  { %p1046_p9 = pnand %p1044_p8, %p1041_p7 }
 0x343   :  { %1049 = shalt.err (!%p1046_p9)
}
 0x344   :  { %647 = dma.vmem_to_hbm [thread:$0]  %s642_s12, 256, %s1367_s10, [#allocation20], %s1090_s1, %s1090_s1, %s1091_s14   ;;  %623 = vst [vmem:[#allocation18 + $0x8] sm:$0xff] %v621_v17 }
 0x345   :  { %s1050_s26 = scalar_lea.vmem %s1320_s23, 256  ;;  %p1055_p11 = scmp.lt.s32.totalorder %s1320_s23, %s1320_s23 }
 0x346   :  { %p1051_p10 = scmp.ne.s32.totalorder %s1320_s23, %s1050_s26  ;;  %p1056_p12 = scmp.lt.s32.totalorder %s1050_s26, %s1050_s26 }
 0x348   :  { %p1057_p13 = por %p1056_p12, %p1055_p11 }
 0x34a   :  { %p1058_p0 = pnand %p1057_p13, %p1051_p10 }
 0x34c   :  { %1061 = shalt.err (!%p1058_p0)
}
 0x34d   :  { %s1062_s15 = scalar_lea.hbm %s1366_s9, 256 }
 0x34e   :  { %p1063_p1 = scmp.ne.s32.totalorder %s1366_s9, %s1062_s15  ;;  %p1066_p2 = scmp.lt.u32.totalorder %s1062_s15, %s1366_s9 }
 0x350   :  { %p1068_p3 = pnand %p1066_p2, %p1063_p1 }
 0x352   :  { %1071 = shalt.err (!%p1068_p3)
}
 0x353   :  { %635 = dma.vmem_to_hbm [thread:$0]  %s1320_s23, 256, %s1366_s9, [#allocation5], %s1090_s1, %s1090_s1, %s1091_s14  }
 0x354   :  { %1082 = dma.done.wait [#allocation5], 256  }
 0x355   :  { %1083 = vsyncadd [#allocation5], 4294967040 }
 0x356   :  { %1084 = dma.done.wait [#allocation20], 256  }
 0x357   :  { %1085 = vsyncadd [#allocation20], 4294967040 }
 0x358   :  { %654 = vsyncpa [#allocation4], 1 }
 0x359   :  { %655 = vsyncpa [#allocation7], 1 }
 0x35a   :  { %656 = vsyncpa [#allocation10], 1 }
 0x35b   :  { %657 = vsyncpa [#allocation13], 1 }
 0x35c   :  { %658 = vsyncpa [#allocation16], 1 }
 0x35d   :  { %659 = vsyncpa [#allocation5], 1 }
 0x35e   :  { %660 = vsyncpa [#allocation20], 1 }

// kernel: tpu_custom_call.1
= control target key start
LH: loop header
LB: loop body
LE: loop exit
PB: predicated region body
PF: predicated region fallthrough
CT: control target
= control target key end

     0   :  { %16 = vsyncpa [#allocation4], 0  ;;  %s1357_s0 = inlined_call_operand.hbm [shape: bf16[16,32], index: 0, kind: input, shape index: {}]   ;;  %s1358_s1 = inlined_call_operand.hbm [shape: bf16[32,128], index: 1, kind: input, shape index: {}]   ;;  %s1359_s2 = inlined_call_operand.hbm [shape: f32[1,128], index: 2, kind: input, shape index: {}]   ;;  %s1360_s3 = inlined_call_operand.hbm [shape: bf16[128,256], index: 3, kind: input, shape index: {}]   ;;  %s1361_s4 = inlined_call_operand.hbm [shape: f32[1,256], index: 4, kind: input, shape index: {}]   ;;  %s1362_s5 = inlined_call_operand.hbm [shape: bf16[128,128], index: 5, kind: input, shape index: {}]   ;;  %s1363_s6 = inlined_call_operand.hbm [shape: f32[1,128], index: 6, kind: input, shape index: {}]   ;;  %s1364_s7 = inlined_call_operand.hbm [shape: bf16[128,128], index: 7, kind: input, shape index: {}]   ;;  %s1365_s8 = inlined_call_operand.hbm [shape: f32[1,128], index: 8, kind: input, shape index: {}]   ;;  %s1366_s9 = inlined_call_operand.hbm [shape: f32[16,128], index: 9, kind: output, shape index: {0}]   ;;  %s1367_s10 = inlined_call_operand.hbm [shape: f32[16,128], index: 10, kind: output, shape index: {1}]  }
   0x1   :  { %17 = vsyncpa [#allocation7], 0 }
   0x2   :  { %18 = vsyncpa [#allocation10], 0 }
   0x3   :  { %19 = vsyncpa [#allocation13], 0 }
   0x4   :  { %20 = vsyncpa [#allocation16], 0 }
   0x5   :  { %21 = vsyncpa [#allocation5], 0 }
   0x6   :  { %22 = vsyncpa [#allocation20], 0  ;;  %s1086_s13 = smov [#allocation6]   ;;  %s1087_s15 = smov [#allocation9]  }
   0x7   :  { %s40_s14 = sshll.u32 %s1086_s13, 4  ;;  %s62_s16 = sshll.u32 %s1087_s15, 4  ;;  %s41_s14 = int_to_ptr.vmem [resolvable:$true] %s40_s14  ;;  %s1159_s16 = int_to_ptr.vmem [resolvable:$true] %s62_s16 }
   0x8   :  { %s830_s19 = scalar_lea.hbm %s1358_s1, 256 }
   0x9   :  { %p831_p0 = scmp.ne.s32.totalorder %s1358_s1, %s830_s19  ;;  %p834_p1 = scmp.lt.u32.totalorder %s830_s19, %s1358_s1 }
   0xb   :  { %p836_p2 = pnand %p834_p1, %p831_p0 }
   0xd   :  { %839 = shalt.err (!%p836_p2)
}
   0xe   :  { %s840_s24 = scalar_lea.vmem %s41_s14, 256  ;;  %p845_p4 = scmp.lt.s32.totalorder %s41_s14, %s41_s14 }
   0xf   :  { %p841_p3 = scmp.ne.s32.totalorder %s41_s14, %s840_s24  ;;  %p846_p5 = scmp.lt.s32.totalorder %s840_s24, %s840_s24 }
  0x11   :  { %p847_p6 = por %p846_p5, %p845_p4 }
  0x13   :  { %p848_p7 = pnand %p847_p6, %p841_p3 }
  0x15   :  { %851 = shalt.err (!%p848_p7)
}
  0x16   :  { %s1088_s25 = smov 64   ;;  %s1089_s26 = smov 4  }
  0x17   :  { %46 = dma.hbm_to_vmem [thread:$0]  %s1358_s1, 256, %s41_s14, [#allocation7], %s1088_s25, %s1088_s25, %s1089_s26  }
  0x18   :  { %s852_s11 = scalar_lea.hbm %s1360_s3, 2048 }
  0x19   :  { %p853_p8 = scmp.ne.s32.totalorder %s1360_s3, %s852_s11  ;;  %p856_p9 = scmp.lt.u32.totalorder %s852_s11, %s1360_s3 }
  0x1b   :  { %p858_p10 = pnand %p856_p9, %p853_p8 }
  0x1d   :  { %861 = shalt.err (!%p858_p10)
}
  0x1e   :  { %s862_s18 = scalar_lea.vmem %s1159_s16, 2048  ;;  %p867_p12 = scmp.lt.s32.totalorder %s1159_s16, %s1159_s16 }
  0x1f   :  { %p863_p11 = scmp.ne.s32.totalorder %s1159_s16, %s862_s18  ;;  %p868_p13 = scmp.lt.s32.totalorder %s862_s18, %s862_s18 }
  0x21   :  { %p869_p0 = por %p868_p13, %p867_p12 }
  0x23   :  { %p870_p1 = pnand %p869_p0, %p863_p11 }
  0x25   :  { %873 = shalt.err (!%p870_p1)
}
  0x26   :  { %s1090_s1 = smov 128   ;;  %s1091_s14 = smov 8  }
  0x27   :  { %68 = dma.hbm_to_vmem [thread:$0]  %s1360_s3, 2048, %s1159_s16, [#allocation10], %s1090_s1, %s1090_s1, %s1091_s14  }
  0x28   :  { %s1092_s21 = smov [#allocation12]   ;;  %s1093_s23 = smov [#allocation15]  }
  0x29   :  { %s84_s22 = sshll.u32 %s1092_s21, 4  ;;  %s106_s24 = sshll.u32 %s1093_s23, 4  ;;  %s85_s22 = int_to_ptr.vmem [resolvable:$true] %s84_s22  ;;  %s1196_s24 = int_to_ptr.vmem [resolvable:$true] %s106_s24 }
  0x2a   :  { %s874_s29 = scalar_lea.hbm %s1362_s5, 1024 }
  0x2b   :  { %p875_p2 = scmp.ne.s32.totalorder %s1362_s5, %s874_s29  ;;  %p878_p3 = scmp.lt.u32.totalorder %s874_s29, %s1362_s5 }
  0x2d   :  { %p880_p4 = pnand %p878_p3, %p875_p2 }
  0x2f   :  { %883 = shalt.err (!%p880_p4)
}
  0x30   :  { %s884_s3 = scalar_lea.vmem %s85_s22, 1024  ;;  %p889_p6 = scmp.lt.s32.totalorder %s85_s22, %s85_s22 }
  0x31   :  { %p885_p5 = scmp.ne.s32.totalorder %s85_s22, %s884_s3  ;;  %p890_p7 = scmp.lt.s32.totalorder %s884_s3, %s884_s3 }
  0x33   :  { %p891_p8 = por %p890_p7, %p889_p6 }
  0x35   :  { %p892_p9 = pnand %p891_p8, %p885_p5 }
  0x37   :  { %895 = shalt.err (!%p892_p9)
}
  0x38   :  { %90 = dma.hbm_to_vmem [thread:$0]  %s1362_s5, 1024, %s85_s22, [#allocation13], %s1088_s25, %s1088_s25, %s1089_s26  }
  0x39   :  { %s896_s19 = scalar_lea.hbm %s1364_s7, 1024 }
  0x3a   :  { %p897_p10 = scmp.ne.s32.totalorder %s1364_s7, %s896_s19  ;;  %p900_p11 = scmp.lt.u32.totalorder %s896_s19, %s1364_s7 }
  0x3c   :  { %p902_p12 = pnand %p900_p11, %p897_p10 }
  0x3e   :  { %905 = shalt.err (!%p902_p12)
}
  0x3f   :  { %s906_s28 = scalar_lea.vmem %s1196_s24, 1024  ;;  %p911_p0 = scmp.lt.s32.totalorder %s1196_s24, %s1196_s24 }
  0x40   :  { %p907_p13 = scmp.ne.s32.totalorder %s1196_s24, %s906_s28  ;;  %p912_p1 = scmp.lt.s32.totalorder %s906_s28, %s906_s28 }
  0x42   :  { %p913_p2 = por %p912_p1, %p911_p0 }
  0x44   :  { %p914_p3 = pnand %p913_p2, %p907_p13 }
  0x46   :  { %917 = shalt.err (!%p914_p3)
}
  0x47   :  { %112 = dma.hbm_to_vmem [thread:$0]  %s1364_s7, 1024, %s1196_s24, [#allocation16], %s1088_s25, %s1088_s25, %s1089_s26  }
  0x48   :  { %s1094_s29 = smov [#allocation3]   ;;  %s1095_s11 = smov [#allocation8]  }
  0x49   :  { %s28_s30 = sshll.u32 %s1094_s29, 4  ;;  %s53_s12 = sshll.u32 %s1095_s11, 4  ;;  %s29_s30 = int_to_ptr.vmem [resolvable:$true] %s28_s30  ;;  %s54_s12 = int_to_ptr.vmem [resolvable:$true] %s53_s12 }
  0x4a   :  { %s918_s16 = scalar_lea.hbm %s1357_s0, 128 }
  0x4b   :  { %p919_p4 = scmp.ne.s32.totalorder %s1357_s0, %s918_s16  ;;  %p922_p5 = scmp.lt.u32.totalorder %s918_s16, %s1357_s0 }
  0x4d   :  { %p924_p6 = pnand %p922_p5, %p919_p4 }
  0x4f   :  { %927 = shalt.err (!%p924_p6)
}
  0x50   :  { %s928_s7 = scalar_lea.vmem %s29_s30, 128  ;;  %p933_p8 = scmp.lt.s32.totalorder %s29_s30, %s29_s30 }
  0x51   :  { %p929_p7 = scmp.ne.s32.totalorder %s29_s30, %s928_s7  ;;  %p934_p9 = scmp.lt.s32.totalorder %s928_s7, %s928_s7 }
  0x53   :  { %p935_p10 = por %p934_p9, %p933_p8 }
  0x55   :  { %p936_p11 = pnand %p935_p10, %p929_p7 }
  0x57   :  { %939 = shalt.err (!%p936_p11)
}
  0x58   :  { %34 = dma.hbm_to_vmem [thread:$0]  %s1357_s0, 128, %s29_s30, [#allocation4], %s1088_s25, %s1088_s25, %s1089_s26  }
  0x59   :  { %s940_s27 = scalar_lea.hbm %s1359_s2, 16 }
  0x5a   :  { %p941_p12 = scmp.ne.s32.totalorder %s1359_s2, %s940_s27  ;;  %p944_p13 = scmp.lt.u32.totalorder %s940_s27, %s1359_s2 }
  0x5c   :  { %p946_p0 = pnand %p944_p13, %p941_p12 }
  0x5e   :  { %949 = shalt.err (!%p946_p0)
}
  0x5f   :  { %s950_s11 = scalar_lea.vmem %s54_s12, 16  ;;  %s954_s13 = scalar_lea.vmem %s54_s12, 32 }
  0x60   :  { %p951_p1 = scmp.ne.s32.totalorder %s54_s12, %s950_s11  ;;  %p955_p2 = scmp.lt.s32.totalorder %s54_s12, %s54_s12 }
  0x61   :  { %p956_p3 = scmp.lt.s32.totalorder %s954_s13, %s950_s11 }
  0x63   :  { %p957_p4 = por %p956_p3, %p955_p2 }
  0x65   :  { %p958_p5 = pnand %p957_p4, %p951_p1 }
  0x67   :  { %961 = shalt.err (!%p958_p5)
}
  0x68   :  { %56 = dma.hbm_to_vmem [thread:$0]  %s1359_s2, 16, %s54_s12, [#allocation7]  }
  0x69   :  { %s1096_s26 = smov [#allocation11]   ;;  %s1097_s3 = smov [#allocation14]  }
  0x6a   :  { %s75_s30 = sshll.u32 %s1096_s26, 4  ;;  %s97_s16 = sshll.u32 %s1097_s3, 4  ;;  %s76_s30 = int_to_ptr.vmem [resolvable:$true] %s75_s30  ;;  %s98_s16 = int_to_ptr.vmem [resolvable:$true] %s97_s16 }
  0x6b   :  { %s962_s18 = scalar_lea.hbm %s1361_s4, 32 }
  0x6c   :  { %p963_p6 = scmp.ne.s32.totalorder %s1361_s4, %s962_s18  ;;  %p966_p7 = scmp.lt.u32.totalorder %s962_s18, %s1361_s4 }
  0x6e   :  { %p968_p8 = pnand %p966_p7, %p963_p6 }
  0x70   :  { %971 = shalt.err (!%p968_p8)
}
  0x71   :  { %s972_s2 = scalar_lea.vmem %s76_s30, 32  ;;  %p977_p10 = scmp.lt.s32.totalorder %s76_s30, %s76_s30 }
  0x72   :  { %p973_p9 = scmp.ne.s32.totalorder %s76_s30, %s972_s2  ;;  %p978_p11 = scmp.lt.s32.totalorder %s972_s2, %s972_s2 }
  0x74   :  { %p979_p12 = por %p978_p11, %p977_p10 }
  0x76   :  { %p980_p13 = pnand %p979_p12, %p973_p9 }
  0x78   :  { %983 = shalt.err (!%p980_p13)
}
  0x79   :  { %78 = dma.hbm_to_vmem [thread:$0]  %s1361_s4, 32, %s76_s30, [#allocation10]  }
  0x7a   :  { %s984_s28 = scalar_lea.hbm %s1363_s6, 16 }
  0x7b   :  { %p985_p0 = scmp.ne.s32.totalorder %s1363_s6, %s984_s28  ;;  %p988_p1 = scmp.lt.u32.totalorder %s984_s28, %s1363_s6 }
  0x7d   :  { %p990_p2 = pnand %p988_p1, %p985_p0 }
  0x7f   :  { %993 = shalt.err (!%p990_p2)
}
  0x80   :  { %s994_s13 = scalar_lea.vmem %s98_s16, 16  ;;  %s998_s0 = scalar_lea.vmem %s98_s16, 32 }
  0x81   :  { %p995_p3 = scmp.ne.s32.totalorder %s98_s16, %s994_s13  ;;  %p999_p4 = scmp.lt.s32.totalorder %s98_s16, %s98_s16 }
  0x82   :  { %p1000_p5 = scmp.lt.s32.totalorder %s998_s0, %s994_s13 }
  0x84   :  { %p1001_p6 = por %p1000_p5, %p999_p4 }
  0x86   :  { %p1002_p7 = pnand %p1001_p6, %p995_p3 }
  0x88   :  { %1005 = shalt.err (!%p1002_p7)
}
  0x89   :  { %100 = dma.hbm_to_vmem [thread:$0]  %s1363_s6, 16, %s98_s16, [#allocation13]  }
  0x8a   :  { %s1098_s26 = smov [#allocation17]   ;;  %s1006_s17 = scalar_lea.hbm %s1365_s8, 16 }
  0x8b   :  { %s119_s30 = sshll.u32 %s1098_s26, 4  ;;  %p1007_p8 = scmp.ne.s32.totalorder %s1365_s8, %s1006_s17  ;;  %s120_s30 = int_to_ptr.vmem [resolvable:$true] %s119_s30 }
  0x8c   :  { %p1010_p9 = scmp.lt.u32.totalorder %s1006_s17, %s1365_s8 }
  0x8e   :  { %p1012_p10 = pnand %p1010_p9, %p1007_p8 }
  0x90   :  { %1015 = shalt.err (!%p1012_p10)
}
  0x91   :  { %s1016_s20 = scalar_lea.vmem %s120_s30, 16  ;;  %s1020_s6 = scalar_lea.vmem %s120_s30, 32 }
  0x92   :  { %p1017_p11 = scmp.ne.s32.totalorder %s120_s30, %s1016_s20  ;;  %p1021_p12 = scmp.lt.s32.totalorder %s120_s30, %s120_s30 }
  0x93   :  { %p1022_p13 = scmp.lt.s32.totalorder %s1020_s6, %s1016_s20 }
  0x95   :  { %p1023_p0 = por %p1022_p13, %p1021_p12 }
  0x97   :  { %p1024_p1 = pnand %p1023_p0, %p1017_p11 }
  0x99   :  { %1027 = shalt.err (!%p1024_p1)
}
  0x9a   :  { %122 = dma.hbm_to_vmem [thread:$0]  %s1365_s8, 16, %s120_s30, [#allocation16]  }
  0x9b   :  { %1072 = dma.done.wait [#allocation4], 128  }
  0x9c   :  { %1073 = vsyncadd [#allocation4], 4294967168 }
  0x9d   :  { %1074 = dma.done.wait [#allocation7], 272  }
  0x9e   :  { %1075 = vsyncadd [#allocation7], 4294967024 }
  0x9f   :  { %1076 = dma.done.wait [#allocation10], 2080  }
  0xa0   :  { %1077 = vsyncadd [#allocation10], 4294965216 }
  0xa1   :  { %1078 = dma.done.wait [#allocation13], 1040  }
  0xa2   :  { %1079 = vsyncadd [#allocation13], 4294966256 }
  0xa3   :  { %1080 = dma.done.wait [#allocation16], 1040  }
  0xa4   :  { %1081 = vsyncadd [#allocation16], 4294966256  ;;  %v1099_v0 = vmov 0.0   ;;  %vm1100_vm0 = vmmov 0   ;;  %v787_v1 = vld [vmem:[#allocation6] sm:$0xff]   ;;  %v788_v2 = vld [vmem:[#allocation6 + $0x8] sm:$0xff]   ;;  %v249_v45 = vlaneseq }
  0xa5   :  { %721 = vmatprep.subr.bf16.mxu0 %v1099_v0  ;;  %725 = vmatprep.mubr.msk.bf16.mxu0 %vm1100_vm0, %v1099_v0  ;;  %v790_v3 = vld [vmem:[#allocation9 + $0x4] ss:$8 sps:$4 sm:$0xff]   ;;  %v792_v4 = vld [vmem:[#allocation9] ss:$8 sps:$4 sm:$0xff]   ;;  %v793_v6 = vld [vmem:[#allocation9 + $0x14] ss:$8 sps:$4 sm:$0xff]  }
  0xa6   :  { %722 = vmatpush3.bf16.msra.mxu0 %v787_v1  ;;  %v789_v5 = vld [vmem:[#allocation3] sm:$0xff]   ;;  %339 = vmatprep.subr.bf16.mxu1 %v790_v3  ;;  %vm185_vm1 = vcmask 261120   ;;  %v795_v7 = vld [vmem:[#allocation9 + $0x10] ss:$8 sps:$4 sm:$0xff]   ;;  %v799_v10 = vld [vmem:[#allocation9 + $0x34] ss:$8 sps:$4 sm:$0xff]  }
  0xa7   :  { %723 = vmatprep.subr.bf16.mxu0 %v1099_v0  ;;  %340 = vmatpush1.bf16.msra.mxu1 %v792_v4  ;;  %v796_v8 = vld [vmem:[#allocation9 + $0x24] ss:$8 sps:$4 sm:$0xff]   ;;  %v798_v9 = vld [vmem:[#allocation9 + $0x20] ss:$8 sps:$4 sm:$0xff]   ;;  %v801_v11 = vld [vmem:[#allocation9 + $0x30] ss:$8 sps:$4 sm:$0xff]  }
  0xa8   :  { %341 = vmatprep.subr.bf16.mxu1 %v793_v6  ;;  %v802_v12 = vld [vmem:[#allocation9 + $0x44] ss:$8 sps:$4 sm:$0xff]   ;;  %v804_v13 = vld [vmem:[#allocation9 + $0x40] ss:$8 sps:$4 sm:$0xff]   ;;  %v805_v14 = vld [vmem:[#allocation9 + $0x54] ss:$8 sps:$4 sm:$0xff]  }
  0xa9   :  { %v807_v15 = vld [vmem:[#allocation9 + $0x50] ss:$8 sps:$4 sm:$0xff]   ;;  %v808_v16 = vld [vmem:[#allocation9 + $0x64] ss:$8 sps:$4 sm:$0xff]   ;;  %v810_v17 = vld [vmem:[#allocation9 + $0x60] ss:$8 sps:$4 sm:$0xff]  }
  0xaa   :  { %724 = vmatpush3.bf16.msra.mxu0 %v788_v2  ;;  %v811_v18 = vld [vmem:[#allocation9 + $0x74] ss:$8 sps:$4 sm:$0xff]   ;;  %v813_v19 = vld [vmem:[#allocation9 + $0x70] ss:$8 sps:$4 sm:$0xff]   ;;  %v1101_v20 = vmov 0   ;;  %v814_v21 = vld [vmem:[#allocation12] sm:$0xff]  }
  0xab   :  { %729 = vmatprep.subr.bf16.mxu0 %v1099_v0  ;;  %342 = vmatpush1.bf16.msra.mxu1 %v795_v7  ;;  %v816_v22 = vld [vmem:[#allocation12 + $0x8] sm:$0xff]   ;;  %v818_v23 = vld [vmem:[#allocation12 + $0x10] sm:$0xff]   ;;  %v820_v24 = vld [vmem:[#allocation12 + $0x18] sm:$0xff]   ;;  %v250_v46 = vshrl.u32 %v249_v45, 7  ;;  %s1102_s8 = smov [#allocation19]   ;;  %s1103_s21 = smov [#allocation18]  }
  0xac   :  { %343 = vmatprep.subr.bf16.mxu1 %v796_v8  ;;  %371 = vmatprep.mubr.bf16.mxu1 %v1101_v20  ;;  %v822_v25 = vld [vmem:[#allocation12 + $0x20] sm:$0xff]   ;;  %v824_v26 = vld [vmem:[#allocation12 + $0x28] sm:$0xff]   ;;  %v661_v27 = vld [vmem:[#allocation8] ss:$0 sm:$0xff]  ;;  %s641_s12 = sshll.u32 %s1102_s8, 4  ;;  %s629_s23 = sshll.u32 %s1103_s21, 4  ;;  %s642_s12 = int_to_ptr.vmem [resolvable:$true] %s641_s12  ;;  %s1320_s23 = int_to_ptr.vmem [resolvable:$true] %s629_s23 }
  0xad   :  { %726 = vmatmul.mubr.msk.bf16.vlgmr.msra.gmra.mrb[0].mxu0 %vm185_vm1, %v789_v5  ;;  %v815_v34 = vld [vmem:[#allocation15] sm:$0xff]   ;;  %v817_v36 = vld [vmem:[#allocation15 + $0x8] sm:$0xff]   ;;  %v819_v37 = vld [vmem:[#allocation15 + $0x10] sm:$0xff]   ;;  %v251_v47 = vsub.s32 0, %v250_v46  ;;  %v255_v49 = vsub.s32 1, %v250_v46  ;;  %s1028_s27 = scalar_lea.vmem %s642_s12, 256  ;;  %p1033_p3 = scmp.lt.s32.totalorder %s642_s12, %s642_s12 }
  0xae   :  { %745 = vmatprep.mubr.msk.bf16.mxu0 %vm1100_vm0, %v1099_v0  ;;  %730 = vmatpush3.bf16.msra.mxu0 %v814_v21  ;;  %v821_v38 = vld [vmem:[#allocation15 + $0x18] sm:$0xff]   ;;  %v823_v39 = vld [vmem:[#allocation15 + $0x20] sm:$0xff]   ;;  %v825_v40 = vld [vmem:[#allocation15 + $0x28] sm:$0xff]   ;;  %p1029_p2 = scmp.ne.s32.totalorder %s642_s12, %s1028_s27  ;;  %p1034_p4 = scmp.lt.s32.totalorder %s1028_s27, %s1028_s27 }
  0xaf   :  { %344 = vmatpush1.bf16.msra.mxu1 %v798_v9  ;;  %731 = vmatprep.subr.bf16.mxu0 %v1099_v0  ;;  %v826_v41 = vld [vmem:[#allocation12 + $0x30] sm:$0xff]   ;;  %v828_v43 = vld [vmem:[#allocation12 + $0x38] sm:$0xff]   ;;  %v682_v2 = vld [vmem:[#allocation14] ss:$0 sm:$0xff] }
  0xb0   :  { %345 = vmatprep.subr.bf16.mxu1 %v799_v10  ;;  %v827_v42 = vld [vmem:[#allocation15 + $0x30] sm:$0xff]   ;;  %v829_v44 = vld [vmem:[#allocation15 + $0x38] sm:$0xff]   ;;  %v691_v3 = vld [vmem:[#allocation17] ss:$0 sm:$0xff]  ;;  %p1035_p5 = por %p1034_p4, %p1033_p3 }
  0xb1   :  { %v247_v48 = vld [vmem:[#allocation11] sm:$0x3] }
  0xb2   :  { %732 = vmatpush3.bf16.msra.mxu0 %v816_v22  ;;  %v252_v50 = vrot.slane %v247_v48, %v251_v47  ;;  %v256_v51 = vrot.slane %v247_v48, %v255_v49  ;;  %p1036_p6 = pnand %p1035_p5, %p1029_p2 }
  0xb3   :  { %346 = vmatpush1.bf16.msra.mxu1 %v801_v11  ;;  %733 = vmatprep.subr.bf16.mxu0 %v1099_v0 }
  0xb4   :  { %347 = vmatprep.subr.bf16.mxu1 %v802_v12 }
  0xb6   :  { %734 = vmatpush3.bf16.msra.mxu0 %v818_v23 }
  0xb7   :  { %348 = vmatpush1.bf16.msra.mxu1 %v804_v13  ;;  %735 = vmatprep.subr.bf16.mxu0 %v1099_v0 }
  0xb8   :  { %349 = vmatprep.subr.bf16.mxu1 %v805_v14 }
  0xba   :  { %736 = vmatpush3.bf16.msra.mxu0 %v820_v24 }
  0xbb   :  { %350 = vmatpush1.bf16.msra.mxu1 %v807_v15  ;;  %737 = vmatprep.subr.bf16.mxu0 %v1099_v0 }
  0xbc   :  { %351 = vmatprep.subr.bf16.mxu1 %v808_v16 }
  0xbe   :  { %738 = vmatpush3.bf16.msra.mxu0 %v822_v25 }
  0xbf   :  { %352 = vmatpush1.bf16.msra.mxu1 %v810_v17  ;;  %739 = vmatprep.subr.bf16.mxu0 %v1099_v0 }
  0xc0   :  { %353 = vmatprep.subr.bf16.mxu1 %v811_v18 }
  0xc2   :  { %740 = vmatpush3.bf16.msra.mxu0 %v824_v26 }
  0xc3   :  { %354 = vmatpush1.bf16.msra.mxu1 %v813_v19  ;;  %741 = vmatprep.subr.bf16.mxu0 %v1099_v0 }
  0xc4   :  { %749 = vmatprep.subr.bf16.mxu1 %v1099_v0 }
  0xc6   :  { %742 = vmatpush3.bf16.msra.mxu0 %v826_v41 }
  0xc7   :  { %743 = vmatprep.subr.bf16.mxu0 %v1099_v0 }
  0xca   :  { %744 = vmatpush3.bf16.msra.mxu0 %v828_v43 }
 0x180   :  { %v223_v28 = vpop.f32.mrb[0].mxu0 }
 0x181   :  { %v727_v29 = vpop.f32.mrb[1].mxu0  ;;  %v224_v31 = vadd.f32 %v661_v27, %v223_v28 }
 0x182   :  { %v226_v30 = vpop.f32.mrb[2].mxu0 }
 0x183   :  { %v227_v32 = vadd.f32 %v661_v27, %v226_v30  ;;  %v728_v33 = vpop.f32.mrb[3].mxu0 }
 0x185   :  { %v230_v35 = vpack.c.bf16 %v227_v32, %v224_v31 }
 0x187   :  { %372 = vmatmul.mubr.bf16.vlgmr.msra.gmra.mrb[0].mxu1 %v230_v35 }
 0x188   :  { %750 = vmatpush3.bf16.msra.mxu1 %v815_v34  ;;  %765 = vmatprep.mubr.msk.bf16.mxu1 %vm1100_vm0, %v1099_v0 }
 0x189   :  { %751 = vmatprep.subr.bf16.mxu1 %v1099_v0 }
 0x18c   :  { %752 = vmatpush3.bf16.msra.mxu1 %v817_v36 }
 0x18d   :  { %753 = vmatprep.subr.bf16.mxu1 %v1099_v0 }
 0x190   :  { %754 = vmatpush3.bf16.msra.mxu1 %v819_v37 }
 0x191   :  { %755 = vmatprep.subr.bf16.mxu1 %v1099_v0 }
 0x194   :  { %756 = vmatpush3.bf16.msra.mxu1 %v821_v38 }
 0x195   :  { %757 = vmatprep.subr.bf16.mxu1 %v1099_v0 }
 0x198   :  { %758 = vmatpush3.bf16.msra.mxu1 %v823_v39 }
 0x199   :  { %759 = vmatprep.subr.bf16.mxu1 %v1099_v0 }
 0x19c   :  { %760 = vmatpush3.bf16.msra.mxu1 %v825_v40 }
 0x19d   :  { %761 = vmatprep.subr.bf16.mxu1 %v1099_v0 }
 0x1a0   :  { %762 = vmatpush3.bf16.msra.mxu1 %v827_v42 }
 0x1a1   :  { %763 = vmatprep.subr.bf16.mxu1 %v1099_v0 }
 0x1a4   :  { %764 = vmatpush3.bf16.msra.mxu1 %v829_v44 }
 0x25a   :  { %v373_v52 = vpop.f32.mrb[0].mxu1 }
 0x25b   :  { %v374_v53 = vadd.f32 %v373_v52, %v252_v50  ;;  %v375_v54 = vpop.f32.mrb[1].mxu1 }
 0x25c   :  { %v376_v55 = vadd.f32 %v375_v54, %v256_v51  ;;  %v377_v56 = vpop.f32.mrb[2].mxu1 }
 0x25d   :  { %v378_v57 = vadd.f32 %v377_v56, %v252_v50  ;;  %v379_v58 = vpop.f32.mrb[3].mxu1  ;;  %v382_v60 = vmax.f32 %v374_v53, 0.0 }
 0x25e   :  { %v380_v59 = vadd.f32 %v379_v58, %v256_v51  ;;  %v383_v62 = vmax.f32 %v376_v55, 0.0 }
 0x25f   :  { %v384_v61 = vmax.f32 %v378_v57, 0.0 }
 0x260   :  { %v385_v63 = vmax.f32 %v380_v59, 0.0 }
 0x261   :  { %v386_v0 = vpack.c.bf16 %v384_v61, %v382_v60 }
 0x262   :  { %v387_v1 = vpack.c.bf16 %v385_v63, %v383_v62 }
 0x263   :  { %746 = vmatmul.mubr.bf16.vlgmr.msra.gmra.mrb[4].mxu0 %v386_v0 }
 0x264   :  { %766 = vmatmul.mubr.bf16.vlgmr.msra.gmra.mrb[4].mxu1 %v387_v1 }
 0x336   :  { %v497_v4 = vpop.f32.mrb[4].mxu0 }
 0x337   :  { %v498_v5 = vadd.f32 %v682_v2, %v497_v4  ;;  %v747_v6 = vpop.f32.mrb[5].mxu0  ;;  %v611_v7 = vpop.f32.mrb[4].mxu1 }
 0x338   :  { %v612_v8 = vadd.f32 %v691_v3, %v611_v7  ;;  %v500_v9 = vpop.f32.mrb[6].mxu0  ;;  %v767_v10 = vpop.f32.mrb[5].mxu1 }
 0x339   :  { %618 = vst [vmem:[#allocation19] sm:$0xff] %v498_v5  ;;  %v501_v11 = vadd.f32 %v682_v2, %v500_v9  ;;  %v748_v12 = vpop.f32.mrb[7].mxu0  ;;  %v614_v13 = vpop.f32.mrb[6].mxu1 }
 0x33a   :  { %v620_v14 = vadd.f32 %v612_v8, %v498_v5  ;;  %v615_v15 = vadd.f32 %v691_v3, %v614_v13  ;;  %v768_v16 = vpop.f32.mrb[7].mxu1 }
 0x33b   :  { %619 = vst [vmem:[#allocation19 + $0x8] sm:$0xff] %v501_v11 }
 0x33c   :  { %622 = vst [vmem:[#allocation18] sm:$0xff] %v620_v14  ;;  %v621_v17 = vadd.f32 %v615_v15, %v501_v11 }
 0x33d   :  { %1039 = shalt.err (!%p1036_p6)
}
 0x33e   :  { %s1040_s22 = scalar_lea.hbm %s1367_s10, 256 }
 0x33f   :  { %p1041_p7 = scmp.ne.s32.totalorder %s1367_s10, %s1040_s22  ;;  %p1044_p8 = scmp.lt.u32.totalorder %s1040_s22, %s1367_s10 }
 0x341   :  { %p1046_p9 = pnand %p1044_p8, %p1041_p7 }
 0x343   :  { %1049 = shalt.err (!%p1046_p9)
}
 0x344   :  { %647 = dma.vmem_to_hbm [thread:$0]  %s642_s12, 256, %s1367_s10, [#allocation20], %s1090_s1, %s1090_s1, %s1091_s14   ;;  %623 = vst [vmem:[#allocation18 + $0x8] sm:$0xff] %v621_v17 }
 0x345   :  { %s1050_s26 = scalar_lea.vmem %s1320_s23, 256  ;;  %p1055_p11 = scmp.lt.s32.totalorder %s1320_s23, %s1320_s23 }
 0x346   :  { %p1051_p10 = scmp.ne.s32.totalorder %s1320_s23, %s1050_s26  ;;  %p1056_p12 = scmp.lt.s32.totalorder %s1050_s26, %s1050_s26 }
 0x348   :  { %p1057_p13 = por %p1056_p12, %p1055_p11 }
 0x34a   :  { %p1058_p0 = pnand %p1057_p13, %p1051_p10 }
 0x34c   :  { %1061 = shalt.err (!%p1058_p0)
}
 0x34d   :  { %s1062_s15 = scalar_lea.hbm %s1366_s9, 256 }
 0x34e   :  { %p1063_p1 = scmp.ne.s32.totalorder %s1366_s9, %s1062_s15  ;;  %p1066_p2 = scmp.lt.u32.totalorder %s1062_s15, %s1366_s9 }
 0x350   :  { %p1068_p3 = pnand %p1066_p2, %p1063_p1 }
 0x352   :  { %1071 = shalt.err (!%p1068_p3)
}
 0x353   :  { %635 = dma.vmem_to_hbm [thread:$0]  %s1320_s23, 256, %s1366_s9, [#allocation5], %s1090_s1, %s1090_s1, %s1091_s14  }
 0x354   :  { %1082 = dma.done.wait [#allocation5], 256  }
 0x355   :  { %1083 = vsyncadd [#allocation5], 4294967040 }
 0x356   :  { %1084 = dma.done.wait [#allocation20], 256  }
 0x357   :  { %1085 = vsyncadd [#allocation20], 4294967040 }
 0x358   :  { %654 = vsyncpa [#allocation4], 1 }
 0x359   :  { %655 = vsyncpa [#allocation7], 1 }
 0x35a   :  { %656 = vsyncpa [#allocation10], 1 }
 0x35b   :  { %657 = vsyncpa [#allocation13], 1 }
 0x35c   :  { %658 = vsyncpa [#allocation16], 1 }
 0x35d   :  { %659 = vsyncpa [#allocation5], 1 }
 0x35e   :  { %660 = vsyncpa [#allocation20], 1 }

</bundles_post_ra>
